<compile_context>
chip_gen: v5e
topology: v5e:2x2
jax: 0.10.0
libtpu: 0.0.40
codegen_flags: <defaults>
</compile_context>

<pallas_src>
import functools
import jax
import jax.numpy as jnp
from jax.experimental import pallas as pl
from jax.experimental.pallas import tpu as pltpu


def _layer_norm_f32(x, w, b, eps=1e-5):
    mean = jnp.mean(x, axis=-1, keepdims=True)
    xc = x - mean
    var = jnp.mean(xc * xc, axis=-1, keepdims=True)
    inv = jax.lax.rsqrt(var + eps)
    return xc * inv * w + b


def fused_encoder_kernel(x_ref, wqkv_ref, wo_ref, w1_ref, w2_ref,
                         small_ref, b1_ref, o_ref, x_sc, *, nhead, batch):
    layer = pl.program_id(0)
    n_layers = pl.num_programs(0)

    # Load the input activation into the VMEM-resident carry on the first layer.
    @pl.when(layer == 0)
    def _():
        x_sc[...] = x_ref[...].astype(jnp.float32)

    x2d = x_sc[...]                                   # (B*S, D) f32, stays in VMEM
    BS, D = x2d.shape
    S = BS // batch
    hd = D // nhead
    scale = 1.0 / float(hd) ** 0.5

    # ---- consolidated tiny per-layer params: one (9, D) tile ----
    small = small_ref[...]
    bq, bk, bv = small[0:1, :], small[1:2, :], small[2:3, :]
    bo, b2 = small[3:4, :], small[4:5, :]
    ln1w, ln1b = small[5:6, :], small[6:7, :]
    ln2w, ln2b = small[7:8, :], small[8:9, :]

    # ---- fused QKV projection: single bf16 MXU push over the flattened batch ----
    x_bf = x2d.astype(jnp.bfloat16)
    qkv = jnp.dot(x_bf, wqkv_ref[...], preferred_element_type=jnp.float32)  # (BS, 3D)
    q = (qkv[:, :D] + bq) * scale                    # 1/sqrt(hd) folded into q
    k = qkv[:, D:2 * D] + bk
    v = qkv[:, 2 * D:] + bv

    # ---- multi-head attention: heads folded into the einsum batch dim ----
    q3 = q.reshape(batch, S, D)
    k3 = k.reshape(batch, S, D)
    v3 = v.reshape(batch, S, D)
    qh = jnp.concatenate([q3[:, :, h * hd:(h + 1) * hd] for h in range(nhead)], axis=0)
    kh = jnp.concatenate([k3[:, :, h * hd:(h + 1) * hd] for h in range(nhead)], axis=0)
    vh = jnp.concatenate([v3[:, :, h * hd:(h + 1) * hd] for h in range(nhead)], axis=0)
    # (nhead*B, S, S) scores; single softmax over all heads/batches.
    s = jnp.einsum('bqd,bkd->bqk', qh, kh, preferred_element_type=jnp.float32)
    s = s - jnp.max(s, axis=-1, keepdims=True)
    p = jnp.exp(s)
    p = p / jnp.sum(p, axis=-1, keepdims=True)       # exact softmax (parity w/ torch)
    ctx_h = jnp.einsum('bqk,bkd->bqd', p, vh, preferred_element_type=jnp.float32)
    # Un-fold heads back onto the feature (lane) axis.
    ctx = jnp.concatenate(
        [ctx_h[h * batch:(h + 1) * batch] for h in range(nhead)], axis=-1
    ).reshape(BS, D)

    attn = jnp.dot(ctx.astype(jnp.bfloat16), wo_ref[...],
                   preferred_element_type=jnp.float32) + bo

    # ---- residual + LayerNorm1 (post-norm, PyTorch default norm_first=False) ----
    x1 = _layer_norm_f32(x2d + attn, ln1w, ln1b)

    # ---- feed-forward: Linear -> ReLU -> Linear (bf16 weights, f32 accum) ----
    h1 = jnp.dot(x1.astype(jnp.bfloat16), w1_ref[...],
                 preferred_element_type=jnp.float32) + b1_ref[...]
    h1 = jnp.maximum(h1, 0.0)
    ffn = jnp.dot(h1.astype(jnp.bfloat16), w2_ref[...],
                  preferred_element_type=jnp.float32) + b2

    # ---- residual + LayerNorm2, write back the carry ----
    y = _layer_norm_f32(x1 + ffn, ln2w, ln2b)
    x_sc[...] = y

    # ---- epilogue: fused mean over the sequence dimension ----
    @pl.when(layer == n_layers - 1)
    def _():
        o_ref[...] = jnp.mean(y.reshape(batch, S, D), axis=1).astype(o_ref.dtype)


def transformer_encoder_forward(x, stacked_params, nhead):
    """x: (B, S, D); stacked_params: (wqkv, wo, w1, w2, small, b1) with leading
    num_layers axis.  Big weights expected in bfloat16, small params in f32."""
    B, S, D = x.shape
    wqkv, wo, w1, w2, small, b1 = stacked_params
    num_layers = wqkv.shape[0]
    x_flat = x.reshape(B * S, D)

    def w_spec(p):
        nd = p.ndim
        # Squeeze the leading layer dim: kernel sees the raw per-layer tile.
        return pl.BlockSpec((None,) + p.shape[1:],
                            lambda l, _nd=nd: (l,) + (0,) * (_nd - 1))

    in_specs = ([pl.BlockSpec((B * S, D), lambda l: (0, 0))]
                + [w_spec(p) for p in (wqkv, wo, w1, w2, small, b1)])

    return pl.pallas_call(
        functools.partial(fused_encoder_kernel, nhead=nhead, batch=B),
        out_shape=jax.ShapeDtypeStruct((B, D), x.dtype),
        grid=(num_layers,),
        in_specs=in_specs,
        out_specs=pl.BlockSpec((B, D), lambda l: (0, 0)),
        scratch_shapes=[pltpu.VMEM((B * S, D), jnp.float32)],
        compiler_params=pltpu.CompilerParams(
            # layer axis is a sequential carry -> must be "arbitrary"
            dimension_semantics=("arbitrary",),
            # per-layer bf16 weight set (~0.27 MiB, double-buffered) + tiny carry;
            # 32 MiB is within scoped VMEM on v5e/v6e/v7x.
            vmem_limit_bytes=32 * 1024 * 1024,
        ),
    )(x_flat, *stacked_params)


def init_layer_params(key, d_model, dim_ff):
    ks = jax.random.split(key, 6)
    std = 0.02
    # All weights stored pre-transposed as (in, out) so the kernel does y = x @ W + b.
    wq = jax.random.normal(ks[0], (d_model, d_model), jnp.float32) * std
    wk = jax.random.normal(ks[1], (d_model, d_model), jnp.float32) * std
    wv = jax.random.normal(ks[2], (d_model, d_model), jnp.float32) * std
    wo = jax.random.normal(ks[3], (d_model, d_model), jnp.float32) * std
    w1 = jax.random.normal(ks[4], (d_model, dim_ff), jnp.float32) * std
    w2 = jax.random.normal(ks[5], (dim_ff, d_model), jnp.float32) * std
    wqkv = jnp.concatenate([wq, wk, wv], axis=1)       # (D, 3D) fused QKV

    zeros = jnp.zeros((d_model,), jnp.float32)
    ones = jnp.ones((d_model,), jnp.float32)
    # rows: 0 bq, 1 bk, 2 bv, 3 bo, 4 b2, 5 ln1w, 6 ln1b, 7 ln2w, 8 ln2b
    small = jnp.stack([zeros, zeros, zeros, zeros, zeros,
                       ones, zeros, ones, zeros], axis=0)
    b1 = jnp.zeros((1, dim_ff), jnp.float32)

    return (
        wqkv.astype(jnp.bfloat16),
        wo.astype(jnp.bfloat16),
        w1.astype(jnp.bfloat16),
        w2.astype(jnp.bfloat16),
        small,
        b1,
    )


def init_stacked_params(key, num_layers, d_model, dim_ff):
    keys = jax.random.split(key, num_layers)
    per_layer = [init_layer_params(k, d_model, dim_ff) for k in keys]
    n = len(per_layer[0])
    return tuple(jnp.stack([p[i] for p in per_layer], axis=0) for i in range(n))


if __name__ == "__main__":
    B, S = 2, 8
    embedding_dim, nhead, num_layers = 32, 4, 2
    dim_feedforward = 2048  # PyTorch nn.TransformerEncoderLayer default

    key = jax.random.PRNGKey(0)
    kx, kp = jax.random.split(key)
    x = jax.random.normal(kx, (B, S, embedding_dim), jnp.float32)
    params = init_stacked_params(kp, num_layers, embedding_dim, dim_feedforward)

    out = transformer_encoder_forward(x, params, nhead)
    out = jax.block_until_ready(out)
    assert out.shape == (B, embedding_dim)
    print("KERNEL_OK")
</pallas_src>

<mosaic_0001>
module attributes {stable_mosaic.version = 11 : i64} {
  func.func @fused_encoder_kernel(%arg0: i32, %arg1: memref<16x32xf32, #tpu.memory_space<vmem>>, %arg2: memref<1x32x96xbf16, #tpu.memory_space<vmem>>, %arg3: memref<1x32x32xbf16, #tpu.memory_space<vmem>>, %arg4: memref<1x32x2048xbf16, #tpu.memory_space<vmem>>, %arg5: memref<1x2048x32xbf16, #tpu.memory_space<vmem>>, %arg6: memref<1x9x32xf32, #tpu.memory_space<vmem>>, %arg7: memref<1x1x2048xf32, #tpu.memory_space<vmem>>, %arg8: memref<2x32xf32, #tpu.memory_space<vmem>>, %arg9: memref<16x32xf32, #tpu.memory_space<vmem>>) attributes {dimension_semantics = [#tpu.dimension_semantics<arbitrary>], iteration_bounds = array<i64: 2>, scalar_prefetch = 0 : i64, scratch_operands = 1 : i64, tpu.core_type = #tpu.core_type<tc>, window_params = [{pipeline_mode = #tpu.pipeline_mode<synchronous>, transform_indices = @transform_0, window_bounds = array<i64: 16, 32>}, {transform_indices = @transform_1, window_bounds = array<i64: 1, 32, 96>}, {transform_indices = @transform_2, window_bounds = array<i64: 1, 32, 32>}, {transform_indices = @transform_3, window_bounds = array<i64: 1, 32, 2048>}, {transform_indices = @transform_4, window_bounds = array<i64: 1, 2048, 32>}, {transform_indices = @transform_5, window_bounds = array<i64: 1, 9, 32>}, {transform_indices = @transform_6, window_bounds = array<i64: 1, 1, 2048>}, {pipeline_mode = #tpu.pipeline_mode<synchronous>, transform_indices = @transform_7, window_bounds = array<i64: 2, 32>}]} {
    %c0_i32 = arith.constant 0 : i32
    %0 = arith.cmpi eq, %arg0, %c0_i32 : i32
    %1 = arith.extui %0 : i1 to i32
    %c0_i32_0 = arith.constant 0 : i32
    %2 = arith.cmpi ne, %1, %c0_i32_0 : i32
    scf.if %2 {
      %c0_42 = arith.constant 0 : index
      %c0_43 = arith.constant 0 : index
      %133 = vector.load %arg1[%c0_42, %c0_43] : memref<16x32xf32, #tpu.memory_space<vmem>>, vector<16x32xf32>
      %c0_44 = arith.constant 0 : index
      %c0_45 = arith.constant 0 : index
      %134 = vector.load %arg9[%c0_44, %c0_45] : memref<16x32xf32, #tpu.memory_space<vmem>>, vector<16x32xf32>
      tpu.vector_store %arg9[%c0_44, %c0_45], %133 {strides = array<i32>} : memref<16x32xf32, #tpu.memory_space<vmem>>, vector<16x32xf32>,
    } else {
    }
    %c0 = arith.constant 0 : index
    %c0_1 = arith.constant 0 : index
    %3 = vector.load %arg9[%c0, %c0_1] : memref<16x32xf32, #tpu.memory_space<vmem>>, vector<16x32xf32>
    %c0_2 = arith.constant 0 : index
    %c0_3 = arith.constant 0 : index
    %c0_4 = arith.constant 0 : index
    %4 = vector.load %arg6[%c0_2, %c0_3, %c0_4] : memref<1x9x32xf32, #tpu.memory_space<vmem>>, vector<1x9x32xf32>
    %5 = vector.shape_cast %4 : vector<1x9x32xf32> to vector<9x32xf32>
    %6 = vector.extract_strided_slice %5 {offsets = [0, 0], sizes = [1, 32], strides = [1, 1]} : vector<9x32xf32> to vector<1x32xf32>
    %7 = vector.extract_strided_slice %5 {offsets = [1, 0], sizes = [1, 32], strides = [1, 1]} : vector<9x32xf32> to vector<1x32xf32>
    %8 = vector.extract_strided_slice %5 {offsets = [2, 0], sizes = [1, 32], strides = [1, 1]} : vector<9x32xf32> to vector<1x32xf32>
    %9 = vector.extract_strided_slice %5 {offsets = [3, 0], sizes = [1, 32], strides = [1, 1]} : vector<9x32xf32> to vector<1x32xf32>
    %10 = vector.extract_strided_slice %5 {offsets = [4, 0], sizes = [1, 32], strides = [1, 1]} : vector<9x32xf32> to vector<1x32xf32>
    %11 = vector.extract_strided_slice %5 {offsets = [5, 0], sizes = [1, 32], strides = [1, 1]} : vector<9x32xf32> to vector<1x32xf32>
    %12 = vector.extract_strided_slice %5 {offsets = [6, 0], sizes = [1, 32], strides = [1, 1]} : vector<9x32xf32> to vector<1x32xf32>
    %13 = vector.extract_strided_slice %5 {offsets = [7, 0], sizes = [1, 32], strides = [1, 1]} : vector<9x32xf32> to vector<1x32xf32>
    %14 = vector.extract_strided_slice %5 {offsets = [8, 0], sizes = [1, 32], strides = [1, 1]} : vector<9x32xf32> to vector<1x32xf32>
    %15 = arith.truncf %3 : vector<16x32xf32> to vector<16x32xbf16>
    %c0_5 = arith.constant 0 : index
    %c0_6 = arith.constant 0 : index
    %c0_7 = arith.constant 0 : index
    %16 = vector.load %arg2[%c0_5, %c0_6, %c0_7] : memref<1x32x96xbf16, #tpu.memory_space<vmem>>, vector<1x32x96xbf16>
    %17 = vector.shape_cast %16 : vector<1x32x96xbf16> to vector<32x96xbf16>
    %cst = arith.constant dense<0.000000e+00> : vector<16x96xf32>
    %18 = tpu.matmul %15, %17, %cst {dimension_numbers = #tpu.dot_dimension_numbers<[1], [0], [0], [1], [0, 0, 1, 1], [], []>} : vector<16x32xbf16>, vector<32x96xbf16>, vector<16x96xf32> -> vector<16x96xf32>
    %19 = vector.extract_strided_slice %18 {offsets = [0, 0], sizes = [16, 32], strides = [1, 1]} : vector<16x96xf32> to vector<16x32xf32>
    %20 = vector.broadcast %6 : vector<1x32xf32> to vector<16x32xf32>
    %21 = arith.addf %19, %20 : vector<16x32xf32>
    %cst_8 = arith.constant 0.353553385 : f32
    %22 = vector.broadcast %cst_8 : f32 to vector<16x32xf32>
    %23 = arith.mulf %21, %22 : vector<16x32xf32>
    %24 = vector.extract_strided_slice %18 {offsets = [0, 32], sizes = [16, 32], strides = [1, 1]} : vector<16x96xf32> to vector<16x32xf32>
    %25 = vector.broadcast %7 : vector<1x32xf32> to vector<16x32xf32>
    %26 = arith.addf %24, %25 : vector<16x32xf32>
    %27 = vector.extract_strided_slice %18 {offsets = [0, 64], sizes = [16, 32], strides = [1, 1]} : vector<16x96xf32> to vector<16x32xf32>
    %28 = vector.broadcast %8 : vector<1x32xf32> to vector<16x32xf32>
    %29 = arith.addf %27, %28 : vector<16x32xf32>
    %30 = vector.shape_cast %23 : vector<16x32xf32> to vector<2x8x32xf32>
    %31 = vector.shape_cast %26 : vector<16x32xf32> to vector<2x8x32xf32>
    %32 = vector.shape_cast %29 : vector<16x32xf32> to vector<2x8x32xf32>
    %33 = vector.extract_strided_slice %30 {offsets = [0, 0, 0], sizes = [2, 8, 8], strides = [1, 1, 1]} : vector<2x8x32xf32> to vector<2x8x8xf32>
    %34 = vector.extract_strided_slice %30 {offsets = [0, 0, 8], sizes = [2, 8, 8], strides = [1, 1, 1]} : vector<2x8x32xf32> to vector<2x8x8xf32>
    %35 = vector.extract_strided_slice %30 {offsets = [0, 0, 16], sizes = [2, 8, 8], strides = [1, 1, 1]} : vector<2x8x32xf32> to vector<2x8x8xf32>
    %36 = vector.extract_strided_slice %30 {offsets = [0, 0, 24], sizes = [2, 8, 8], strides = [1, 1, 1]} : vector<2x8x32xf32> to vector<2x8x8xf32>
    %37 = tpu.concatenate %33, %34, %35, %36 in 0 : vector<2x8x8xf32>, vector<2x8x8xf32>, vector<2x8x8xf32>, vector<2x8x8xf32> -> vector<8x8x8xf32>
    %38 = vector.extract_strided_slice %31 {offsets = [0, 0, 0], sizes = [2, 8, 8], strides = [1, 1, 1]} : vector<2x8x32xf32> to vector<2x8x8xf32>
    %39 = vector.extract_strided_slice %31 {offsets = [0, 0, 8], sizes = [2, 8, 8], strides = [1, 1, 1]} : vector<2x8x32xf32> to vector<2x8x8xf32>
    %40 = vector.extract_strided_slice %31 {offsets = [0, 0, 16], sizes = [2, 8, 8], strides = [1, 1, 1]} : vector<2x8x32xf32> to vector<2x8x8xf32>
    %41 = vector.extract_strided_slice %31 {offsets = [0, 0, 24], sizes = [2, 8, 8], strides = [1, 1, 1]} : vector<2x8x32xf32> to vector<2x8x8xf32>
    %42 = tpu.concatenate %38, %39, %40, %41 in 0 : vector<2x8x8xf32>, vector<2x8x8xf32>, vector<2x8x8xf32>, vector<2x8x8xf32> -> vector<8x8x8xf32>
    %43 = vector.extract_strided_slice %32 {offsets = [0, 0, 0], sizes = [2, 8, 8], strides = [1, 1, 1]} : vector<2x8x32xf32> to vector<2x8x8xf32>
    %44 = vector.extract_strided_slice %32 {offsets = [0, 0, 8], sizes = [2, 8, 8], strides = [1, 1, 1]} : vector<2x8x32xf32> to vector<2x8x8xf32>
    %45 = vector.extract_strided_slice %32 {offsets = [0, 0, 16], sizes = [2, 8, 8], strides = [1, 1, 1]} : vector<2x8x32xf32> to vector<2x8x8xf32>
    %46 = vector.extract_strided_slice %32 {offsets = [0, 0, 24], sizes = [2, 8, 8], strides = [1, 1, 1]} : vector<2x8x32xf32> to vector<2x8x8xf32>
    %47 = tpu.concatenate %43, %44, %45, %46 in 0 : vector<2x8x8xf32>, vector<2x8x8xf32>, vector<2x8x8xf32>, vector<2x8x8xf32> -> vector<8x8x8xf32>
    "tpu.trace_start"() <{level = 10 : i32, message = "bqd,bkd->bqk"}> : () -> ()
    %cst_9 = arith.constant dense<0.000000e+00> : vector<8x8x8xf32>
    %48 = tpu.matmul %37, %42, %cst_9 {dimension_numbers = #tpu.dot_dimension_numbers<[2], [2], [1], [1], [0, 0, 0, 1, 1, 1], [0], [0]>} : vector<8x8x8xf32>, vector<8x8x8xf32>, vector<8x8x8xf32> -> vector<8x8x8xf32>
    "tpu.trace_stop"() : () -> ()
    %cst_10 = arith.constant dense<0xFF800000> : vector<8x8xf32>
    %49 = vector.multi_reduction <maximumf>, %48, %cst_10 [2] : vector<8x8x8xf32> to vector<8x8xf32>
    %50 = vector.shape_cast %49 : vector<8x8xf32> to vector<8x8x1xf32>
    %51 = vector.broadcast %50 : vector<8x8x1xf32> to vector<8x8x8xf32>
    %52 = arith.subf %48, %51 : vector<8x8x8xf32>
    %53 = math.exp %52 : vector<8x8x8xf32>
    %cst_11 = arith.constant dense<0.000000e+00> : vector<8x8xf32>
    %54 = vector.multi_reduction <add>, %53, %cst_11 [2] : vector<8x8x8xf32> to vector<8x8xf32>
    %55 = vector.shape_cast %54 : vector<8x8xf32> to vector<8x8x1xf32>
    %56 = vector.broadcast %55 : vector<8x8x1xf32> to vector<8x8x8xf32>
    %57 = arith.divf %53, %56 : vector<8x8x8xf32>
    "tpu.trace_start"() <{level = 10 : i32, message = "bqk,bkd->bqd"}> : () -> ()
    %cst_12 = arith.constant dense<0.000000e+00> : vector<8x8x8xf32>
    %58 = tpu.matmul %57, %47, %cst_12 {dimension_numbers = #tpu.dot_dimension_numbers<[2], [1], [1], [2], [0, 0, 0, 1, 1, 2], [0], [0]>} : vector<8x8x8xf32>, vector<8x8x8xf32>, vector<8x8x8xf32> -> vector<8x8x8xf32>
    "tpu.trace_stop"() : () -> ()
    %59 = vector.extract_strided_slice %58 {offsets = [0, 0, 0], sizes = [2, 8, 8], strides = [1, 1, 1]} : vector<8x8x8xf32> to vector<2x8x8xf32>
    %60 = vector.extract_strided_slice %58 {offsets = [2, 0, 0], sizes = [2, 8, 8], strides = [1, 1, 1]} : vector<8x8x8xf32> to vector<2x8x8xf32>
    %61 = vector.extract_strided_slice %58 {offsets = [4, 0, 0], sizes = [2, 8, 8], strides = [1, 1, 1]} : vector<8x8x8xf32> to vector<2x8x8xf32>
    %62 = vector.extract_strided_slice %58 {offsets = [6, 0, 0], sizes = [2, 8, 8], strides = [1, 1, 1]} : vector<8x8x8xf32> to vector<2x8x8xf32>
    %63 = tpu.concatenate %59, %60, %61, %62 in 2 : vector<2x8x8xf32>, vector<2x8x8xf32>, vector<2x8x8xf32>, vector<2x8x8xf32> -> vector<2x8x32xf32>
    %64 = vector.shape_cast %63 : vector<2x8x32xf32> to vector<16x32xf32>
    %65 = arith.truncf %64 : vector<16x32xf32> to vector<16x32xbf16>
    %c0_13 = arith.constant 0 : index
    %c0_14 = arith.constant 0 : index
    %c0_15 = arith.constant 0 : index
    %66 = vector.load %arg3[%c0_13, %c0_14, %c0_15] : memref<1x32x32xbf16, #tpu.memory_space<vmem>>, vector<1x32x32xbf16>
    %67 = vector.shape_cast %66 : vector<1x32x32xbf16> to vector<32x32xbf16>
    %cst_16 = arith.constant dense<0.000000e+00> : vector<16x32xf32>
    %68 = tpu.matmul %65, %67, %cst_16 {dimension_numbers = #tpu.dot_dimension_numbers<[1], [0], [0], [1], [0, 0, 1, 1], [], []>} : vector<16x32xbf16>, vector<32x32xbf16>, vector<16x32xf32> -> vector<16x32xf32>
    %69 = vector.broadcast %9 : vector<1x32xf32> to vector<16x32xf32>
    %70 = arith.addf %68, %69 : vector<16x32xf32>
    %71 = arith.addf %3, %70 : vector<16x32xf32>
    %cst_17 = arith.constant dense<0.000000e+00> : vector<16xf32>
    %72 = vector.multi_reduction <add>, %71, %cst_17 [1] : vector<16x32xf32> to vector<16xf32>
    %73 = vector.shape_cast %72 : vector<16xf32> to vector<16x1xf32>
    %cst_18 = arith.constant 3.200000e+01 : f32
    %74 = vector.broadcast %cst_18 : f32 to vector<16x1xf32>
    %75 = arith.divf %73, %74 : vector<16x1xf32>
    %76 = vector.broadcast %75 : vector<16x1xf32> to vector<16x32xf32>
    %77 = arith.subf %71, %76 : vector<16x32xf32>
    %78 = arith.mulf %77, %77 : vector<16x32xf32>
    %cst_19 = arith.constant dense<0.000000e+00> : vector<16xf32>
    %79 = vector.multi_reduction <add>, %78, %cst_19 [1] : vector<16x32xf32> to vector<16xf32>
    %80 = vector.shape_cast %79 : vector<16xf32> to vector<16x1xf32>
    %cst_20 = arith.constant 3.200000e+01 : f32
    %81 = vector.broadcast %cst_20 : f32 to vector<16x1xf32>
    %82 = arith.divf %80, %81 : vector<16x1xf32>
    %cst_21 = arith.constant 9.99999974E-6 : f32
    %83 = vector.broadcast %cst_21 : f32 to vector<16x1xf32>
    %84 = arith.addf %82, %83 : vector<16x1xf32>
    %85 = math.rsqrt %84 : vector<16x1xf32>
    %86 = vector.broadcast %85 : vector<16x1xf32> to vector<16x32xf32>
    %87 = arith.mulf %77, %86 : vector<16x32xf32>
    %88 = vector.broadcast %11 : vector<1x32xf32> to vector<16x32xf32>
    %89 = arith.mulf %87, %88 : vector<16x32xf32>
    %90 = vector.broadcast %12 : vector<1x32xf32> to vector<16x32xf32>
    %91 = arith.addf %89, %90 : vector<16x32xf32>
    %92 = arith.truncf %91 : vector<16x32xf32> to vector<16x32xbf16>
    %c0_22 = arith.constant 0 : index
    %c0_23 = arith.constant 0 : index
    %c0_24 = arith.constant 0 : index
    %93 = vector.load %arg4[%c0_22, %c0_23, %c0_24] : memref<1x32x2048xbf16, #tpu.memory_space<vmem>>, vector<1x32x2048xbf16>
    %94 = vector.shape_cast %93 : vector<1x32x2048xbf16> to vector<32x2048xbf16>
    %cst_25 = arith.constant dense<0.000000e+00> : vector<16x2048xf32>
    %95 = tpu.matmul %92, %94, %cst_25 {dimension_numbers = #tpu.dot_dimension_numbers<[1], [0], [0], [1], [0, 0, 1, 1], [], []>} : vector<16x32xbf16>, vector<32x2048xbf16>, vector<16x2048xf32> -> vector<16x2048xf32>
    %c0_26 = arith.constant 0 : index
    %c0_27 = arith.constant 0 : index
    %c0_28 = arith.constant 0 : index
    %96 = vector.load %arg7[%c0_26, %c0_27, %c0_28] : memref<1x1x2048xf32, #tpu.memory_space<vmem>>, vector<1x1x2048xf32>
    %97 = vector.shape_cast %96 : vector<1x1x2048xf32> to vector<1x2048xf32>
    %98 = vector.broadcast %97 : vector<1x2048xf32> to vector<16x2048xf32>
    %99 = arith.addf %95, %98 : vector<16x2048xf32>
    %cst_29 = arith.constant 0.000000e+00 : f32
    %100 = vector.broadcast %cst_29 : f32 to vector<16x2048xf32>
    %101 = arith.maximumf %99, %100 : vector<16x2048xf32>
    %102 = arith.truncf %101 : vector<16x2048xf32> to vector<16x2048xbf16>
    %c0_30 = arith.constant 0 : index
    %c0_31 = arith.constant 0 : index
    %c0_32 = arith.constant 0 : index
    %103 = vector.load %arg5[%c0_30, %c0_31, %c0_32] : memref<1x2048x32xbf16, #tpu.memory_space<vmem>>, vector<1x2048x32xbf16>
    %104 = vector.shape_cast %103 : vector<1x2048x32xbf16> to vector<2048x32xbf16>
    %cst_33 = arith.constant dense<0.000000e+00> : vector<16x32xf32>
    %105 = tpu.matmul %102, %104, %cst_33 {dimension_numbers = #tpu.dot_dimension_numbers<[1], [0], [0], [1], [0, 0, 1, 1], [], []>} : vector<16x2048xbf16>, vector<2048x32xbf16>, vector<16x32xf32> -> vector<16x32xf32>
    %106 = vector.broadcast %10 : vector<1x32xf32> to vector<16x32xf32>
    %107 = arith.addf %105, %106 : vector<16x32xf32>
    %108 = arith.addf %91, %107 : vector<16x32xf32>
    %cst_34 = arith.constant dense<0.000000e+00> : vector<16xf32>
    %109 = vector.multi_reduction <add>, %108, %cst_34 [1] : vector<16x32xf32> to vector<16xf32>
    %110 = vector.shape_cast %109 : vector<16xf32> to vector<16x1xf32>
    %cst_35 = arith.constant 3.200000e+01 : f32
    %111 = vector.broadcast %cst_35 : f32 to vector<16x1xf32>
    %112 = arith.divf %110, %111 : vector<16x1xf32>
    %113 = vector.broadcast %112 : vector<16x1xf32> to vector<16x32xf32>
    %114 = arith.subf %108, %113 : vector<16x32xf32>
    %115 = arith.mulf %114, %114 : vector<16x32xf32>
    %cst_36 = arith.constant dense<0.000000e+00> : vector<16xf32>
    %116 = vector.multi_reduction <add>, %115, %cst_36 [1] : vector<16x32xf32> to vector<16xf32>
    %117 = vector.shape_cast %116 : vector<16xf32> to vector<16x1xf32>
    %cst_37 = arith.constant 3.200000e+01 : f32
    %118 = vector.broadcast %cst_37 : f32 to vector<16x1xf32>
    %119 = arith.divf %117, %118 : vector<16x1xf32>
    %cst_38 = arith.constant 9.99999974E-6 : f32
    %120 = vector.broadcast %cst_38 : f32 to vector<16x1xf32>
    %121 = arith.addf %119, %120 : vector<16x1xf32>
    %122 = math.rsqrt %121 : vector<16x1xf32>
    %123 = vector.broadcast %122 : vector<16x1xf32> to vector<16x32xf32>
    %124 = arith.mulf %114, %123 : vector<16x32xf32>
    %125 = vector.broadcast %13 : vector<1x32xf32> to vector<16x32xf32>
    %126 = arith.mulf %124, %125 : vector<16x32xf32>
    %127 = vector.broadcast %14 : vector<1x32xf32> to vector<16x32xf32>
    %128 = arith.addf %126, %127 : vector<16x32xf32>
    %c0_39 = arith.constant 0 : index
    %c0_40 = arith.constant 0 : index
    %129 = vector.load %arg9[%c0_39, %c0_40] : memref<16x32xf32, #tpu.memory_space<vmem>>, vector<16x32xf32>
    tpu.vector_store %arg9[%c0_39, %c0_40], %128 {strides = array<i32>} : memref<16x32xf32, #tpu.memory_space<vmem>>, vector<16x32xf32>,
    %c1_i32 = arith.constant 1 : i32
    %130 = arith.cmpi eq, %arg0, %c1_i32 : i32
    %131 = arith.extui %130 : i1 to i32
    %c0_i32_41 = arith.constant 0 : i32
    %132 = arith.cmpi ne, %131, %c0_i32_41 : i32
    scf.if %132 {
      %133 = vector.shape_cast %128 : vector<16x32xf32> to vector<2x8x32xf32>
      %cst_42 = arith.constant dense<0.000000e+00> : vector<2x32xf32>
      %134 = vector.multi_reduction <add>, %133, %cst_42 [1] : vector<2x8x32xf32> to vector<2x32xf32>
      %cst_43 = arith.constant 8.000000e+00 : f32
      %135 = vector.broadcast %cst_43 : f32 to vector<2x32xf32>
      %136 = arith.divf %134, %135 : vector<2x32xf32>
      %c0_44 = arith.constant 0 : index
      %c0_45 = arith.constant 0 : index
      %137 = vector.load %arg8[%c0_44, %c0_45] : memref<2x32xf32, #tpu.memory_space<vmem>>, vector<2x32xf32>
      tpu.vector_store %arg8[%c0_44, %c0_45], %136 {strides = array<i32>} : memref<2x32xf32, #tpu.memory_space<vmem>>, vector<2x32xf32>,
    } else {
    }
    return
  }
  func.func @transform_0(%arg0: i32) -> (i32, i32) {
    %c0_i32 = arith.constant 0 : i32
    %c0_i32_0 = arith.constant 0 : i32
    %c0_i32_1 = arith.constant 0 : i32
    return %c0_i32, %c0_i32_0 : i32, i32
  }
  func.func @transform_1(%arg0: i32) -> (i32, i32, i32) {
    %c0_i32 = arith.constant 0 : i32
    %c0_i32_0 = arith.constant 0 : i32
    %c0_i32_1 = arith.constant 0 : i32
    return %arg0, %c0_i32, %c0_i32_0 : i32, i32, i32
  }
  func.func @transform_2(%arg0: i32) -> (i32, i32, i32) {
    %c0_i32 = arith.constant 0 : i32
    %c0_i32_0 = arith.constant 0 : i32
    %c0_i32_1 = arith.constant 0 : i32
    return %arg0, %c0_i32, %c0_i32_0 : i32, i32, i32
  }
  func.func @transform_3(%arg0: i32) -> (i32, i32, i32) {
    %c0_i32 = arith.constant 0 : i32
    %c0_i32_0 = arith.constant 0 : i32
    %c0_i32_1 = arith.constant 0 : i32
    return %arg0, %c0_i32, %c0_i32_0 : i32, i32, i32
  }
  func.func @transform_4(%arg0: i32) -> (i32, i32, i32) {
    %c0_i32 = arith.constant 0 : i32
    %c0_i32_0 = arith.constant 0 : i32
    %c0_i32_1 = arith.constant 0 : i32
    return %arg0, %c0_i32, %c0_i32_0 : i32, i32, i32
  }
  func.func @transform_5(%arg0: i32) -> (i32, i32, i32) {
    %c0_i32 = arith.constant 0 : i32
    %c0_i32_0 = arith.constant 0 : i32
    %c0_i32_1 = arith.constant 0 : i32
    return %arg0, %c0_i32, %c0_i32_0 : i32, i32, i32
  }
  func.func @transform_6(%arg0: i32) -> (i32, i32, i32) {
    %c0_i32 = arith.constant 0 : i32
    %c0_i32_0 = arith.constant 0 : i32
    %c0_i32_1 = arith.constant 0 : i32
    return %arg0, %c0_i32, %c0_i32_0 : i32, i32, i32
  }
  func.func @transform_7(%arg0: i32) -> (i32, i32) {
    %c0_i32 = arith.constant 0 : i32
    %c0_i32_0 = arith.constant 0 : i32
    %c0_i32_1 = arith.constant 0 : i32
    return %c0_i32, %c0_i32_0 : i32, i32
  }
}

</mosaic_0001>

<bundles_post_ra>
// kernel: tpu_custom_call.1
= control target key start
LH: loop header
LB: loop body
LE: loop exit
PB: predicated region body
PF: predicated region fallthrough
CT: control target
= control target key end

     0   :  { %12 = vsyncpa [#allocation4], 0  ;;  %s4259_s24 = smov 0   ;;  %s4762_s0 = inlined_call_operand.vmem [shape: f32[16,32], index: 0, kind: input, shape index: {}]   ;;  %s4763_s1 = inlined_call_operand.vmem [shape: bf16[2,32,96], index: 1, kind: input, shape index: {}]   ;;  %s4764_s2 = inlined_call_operand.vmem [shape: bf16[2,32,32], index: 2, kind: input, shape index: {}]   ;;  %s4765_s3 = inlined_call_operand.vmem [shape: bf16[2,32,2048], index: 3, kind: input, shape index: {}]   ;;  %s4766_s4 = inlined_call_operand.vmem [shape: bf16[2,2048,32], index: 4, kind: input, shape index: {}]   ;;  %s4767_s5 = inlined_call_operand.vmem [shape: f32[2,9,32], index: 5, kind: input, shape index: {}]   ;;  %s4768_s6 = inlined_call_operand.vmem [shape: f32[2,1,2048], index: 6, kind: input, shape index: {}]   ;;  %s4769_s7 = inlined_call_operand.hbm [shape: f32[2,32], index: 7, kind: output, shape index: {}]  }
   0x1 LB: > { %s4265_s25 = sadd.s32 4294967295, %s4205_s24   ;;  %p3159_p0 = scmp.ge.s32.totalorder %s4205_s24, 1  ;;  %s4205_s24 = sphi %s4259_s24, %s18_s24  }
   0x2   : > { %p282_p1 = scmp.lt.s32.totalorder %s4205_s24, 3 }
   0x4   : > { %p283_p2 = pnand %p3159_p0, %p282_p1 }
   0x5   : > { %p333_p3 = scmp.lt.s32.totalorder (!%p283_p2), %s4265_s25, 1  ;;  %p3171_p4 = scmp.ne.s32.totalorder (!%p283_p2), %s4265_s25, 0 }
   0x6   : > { %286 = sbr.rel (%p283_p2) target bundleno = 2172 (0x87c), region = 48 }
   0xb   : > { %s334_s26 = scalar_select %p333_p3, %s4265_s25, 1 }
   0xd   : > { %s3875_s27 = sshll.u32 %s334_s26, 4  ;;  %s3877_s28 = sshll.u32 %s334_s26, 8 }
   0xe   : > { %s337_s8 = scalar_lea.vmem %s4763_s1, %s3875_s27  ;;  %s4277_s11 = scalar_lea.vmem %s4764_s2, %s3875_s27 }
   0xf   : > { %s4282_s14 = scalar_lea.vmem %s4765_s3, %s3877_s28  ;;  %s3878_s15 = sshll.u32 %s334_s26, 10 }
  0x10   : > { %s4287_s18 = scalar_lea.vmem %s4766_s4, %s3878_s15  ;;  %s4292_s21 = scalar_lea.vmem %s4767_s5, %s3875_s27 }
  0x11   : > { %s4297_s29 = scalar_lea.vmem %s4768_s6, %s3875_s27  ;;  %366 = sbr.rel (%p3171_p4) target bundleno = 25 (0x19), region = 52 }
  0x16   : > { %v367_v0 = vld [vmem:[%s4762_s0] sm:$0xff]  ;;  %vm369_vm0 = vcmask 261120   ;;  %v368_v1 = vld [vmem:[%s4762_s0 + $0x8] sm:$0xff] }
  0x17   : > { %370 = vst.msk [vmem:[#allocation2] sm:$0xff] %vm369_vm0, %v367_v0 }
  0x18   : > { %371 = vst.msk [vmem:[#allocation2 + $0x8] sm:$0xff] %vm369_vm0, %v368_v1 }
  0x19 PF: > { %v3881_v2 = vld [vmem:[%s337_s8 + $0x8] sm:$0xff]  ;;  %v4307_v3 = vld [vmem:[%s4292_s21] sm:$0xff]  ;;  %s4207_s27 = smov 32   ;;  %vm393_vm1 = vcmask 261120   ;;  %s4209_s10 = smov 112   ;;  %vm474_vm2 = vcmask 64512  }
  0x1a   : > { %403 = vmatpush.bf16.msra.mxu0 %v3881_v2  ;;  %v3880_v4 = vld [vmem:[%s337_s8] sm:$0xff]  ;;  %v416_v7 = vperm.slane %v4307_v3, 1  ;;  %s4208_s8 = smov 120   ;;  %s4210_s12 = smov 104   ;;  %v411_v14 = vperm.slane %v4307_v3, 0  ;;  %v423_v27 = vperm.slane %v4307_v3, 2 }
  0x1b   : > { %s4211_s13 = smov 96   ;;  %s4212_s15 = smov 64  }
  0x1c   : > { %418 = vrot.lane.b32.xlu0 %v416_v7, %s4207_s27  ;;  %s4213_s16 = smov 8   ;;  %s4214_s17 = smov 24  }
  0x1d   : > { %s4215_s19 = smov 16   ;;  %p3870_p5 = scmp.ne.s32.totalorder %s4265_s25, 1 }
  0x1e   : > { %v4309_v5 = vld [vmem:[#allocation2] sm:$0xff]  ;;  %404 = vmatpush.bf16.msra.mxu0 %v3880_v4 }
  0x1f   : > { %v4311_v6 = vld [vmem:[#allocation2 + $0x8] sm:$0xff] }
  0x20   : > { %v376_v8 = vpack.c.bf16 %v4311_v6, %v4309_v5 }
  0x22   : > { %3180 = vmatmul.msk.bf16.vlgmr.msra.gmra.mxu0 %vm393_vm1, %v376_v8 }
  0x8e   : > { %v419_v9 = vpop.permute.xlu0 %418 }
  0x9f   : > { %v4317_v10 = vpop.f32.mrf.mxu0 }
  0xa0   : > { %v421_v11 = vadd.f32 %v419_v9, %v4317_v10  ;;  %v412_v15 = vadd.f32 %v411_v14, %v4317_v10 }
  0xa2   : > { %446 = vrot.lane.b32.xlu2 %v421_v11, %s4208_s8  ;;  %450 = vrot.lane.b32.xlu0 %v421_v11, %s4209_s10  ;;  %v414_v16 = vmul.f32 0.35355338, %v412_v15 }
  0xa7   : > { %v4322_v12 = vpop.f32.mrf.mxu0 }
  0xa8   : > { %v422_v13 = vadd.f32 %v419_v9, %v4322_v12  ;;  %v413_v17 = vadd.f32 %v411_v14, %v4322_v12 }
  0xaa   : > { %454 = vrot.lane.b32.xlu0 %v421_v11, %s4210_s12  ;;  %452 = vrot.lane.b32.xlu2 %v422_v13, %s4209_s10  ;;  %v415_v18 = vmul.f32 0.35355338, %v413_v17 }
  0xab   : > { %448 = vrot.lane.b32.xlu1 %v422_v13, %s4208_s8 }
  0xb2   : > { %472 = vrot.lane.b32.xlu2 %v421_v11, %s4211_s13 }
  0xb3   : > { %456 = vrot.lane.b32.xlu1 %v422_v13, %s4210_s12 }
  0xbb   : > { %499 = vrot.lane.b32.xlu1 %v422_v13, %s4211_s13 }
  0xc3   : > { %436 = vrot.lane.b32.xlu1 %v414_v16, %s4209_s10 }
  0xcb   : > { %434 = vrot.lane.b32.xlu1 %v415_v18, %s4208_s8 }
  0xfc   : > { %v447_v19 = vpop.permute.xlu2 %446 }
 0x104   : > { %v453_v20 = vpop.permute.xlu2 %452 }
 0x105   : > { %603 = vrot.lane.b32.xlu1 %v453_v20, %s4211_s13 }
 0x10c   : > { %v473_v21 = vpop.permute.xlu2 %472 }
 0x10d   : > { %3181 = vmatpush.xpose.msk.msra.mxu1 %vm474_vm2, %v473_v21 }
 0x110   : > { %3182 = vmatmul.msk.f32.vlgmr.msra.gmra.mxu1 %vm474_vm2, %v414_v16 }
 0x114   : > { %v451_v22 = vpop.permute.xlu0 %450 }
 0x115   : > { %577 = vrot.lane.b32.xlu0 %v451_v22, %s4211_s13 }
 0x11c   : > { %v455_v23 = vpop.permute.xlu0 %454 }
 0x11d   : > { %v449_v24 = vpop.permute.xlu1 %448  ;;  %525 = vrot.lane.b32.xlu0 %v447_v19, %s4211_s13  ;;  %629 = vrot.lane.b32.xlu1 %v455_v23, %s4211_s13 }
 0x11e   : > { %551 = vrot.lane.b32.xlu2 %v449_v24, %s4211_s13 }
 0x125   : > { %v457_v25 = vpop.permute.xlu1 %456 }
 0x126   : > { %655 = vrot.lane.b32.xlu0 %v457_v25, %s4211_s13  ;;  %442 = vrot.lane.b32.xlu2 %v415_v18, %s4210_s12 }
 0x12d   : > { %v500_v26 = vpop.permute.xlu1 %499 }
 0x12e   : > { %3183 = vmatpush.xpose.msk.msra.mxu2 %vm474_vm2, %v500_v26  ;;  %438 = vrot.lane.b32.xlu0 %v415_v18, %s4209_s10 }
 0x12f   : > { %432 = vrot.lane.b32.xlu2 %v414_v16, %s4208_s8 }
 0x131   : > { %3184 = vmatmul.msk.f32.vlgmr.msra.gmra.mxu2 %vm474_vm2, %v415_v18 }
 0x135   : > { %v437_v28 = vpop.permute.xlu1 %436 }
 0x136   : > { %425 = vrot.lane.b32.xlu0 %v423_v27, %s4212_s15 }
 0x137   : > { %440 = vrot.lane.b32.xlu2 %v414_v16, %s4210_s12 }
 0x13d   : > { %v435_v29 = vpop.permute.xlu1 %434 }
 0x177   : > { %v604_v30 = vpop.permute.xlu1 %603 }
 0x178   : > { %v552_v31 = vpop.permute.xlu2 %551  ;;  %3191 = vmatpush.xpose.msk.msra.mxu3 %vm474_vm2, %v604_v30 }
 0x179   : > { %3187 = vmatpush.xpose.msk.msrb.mxu1 %vm474_vm2, %v552_v31 }
 0x17c   : > { %3188 = vmatmul.msk.f32.vlgmr.msrb.gmra.mxu1 %vm474_vm2, %v435_v29 }
 0x180   : > { %v443_v32 = vpop.permute.xlu2 %442 }
 0x187   : > { %v578_v33 = vpop.permute.xlu0 %577 }
 0x188   : > { %3189 = vmatpush.xpose.msk.msrb.mxu2 %vm474_vm2, %v578_v33 }
 0x189   : > { %v433_v34 = vpop.permute.xlu2 %432 }
 0x18b   : > { %3190 = vmatmul.msk.f32.vlgmr.msrb.gmra.mxu2 %vm474_vm2, %v437_v28 }
 0x18d   : > { %v496_v35 = vpop.f32.mrf.mxu1 }
 0x18e   : > { %v681_v36 = vsel %vm474_vm2, %v496_v35, -inf }
 0x18f   : > { %v526_v37 = vpop.permute.xlu0 %525  ;;  %682 = vmax.xlane.f32.xlu1 %v681_v36  ;;  %v630_v38 = vpop.permute.xlu1 %629 }
 0x190   : > { %3185 = vmatpush.xpose.msk.msrb.mxu0 %vm474_vm2, %v526_v37  ;;  %3193 = vmatpush.xpose.msk.msra.mxu1 %vm474_vm2, %v630_v38 }
 0x191   : > { %v441_v39 = vpop.permute.xlu2 %440 }
 0x193   : > { %3186 = vmatmul.msk.f32.vlgmr.msrb.gmra.mxu0 %vm474_vm2, %v433_v34  ;;  %3194 = vmatmul.msk.f32.vlgmr.msra.gmra.mxu1 %vm474_vm2, %v441_v39 }
 0x198   : > { %v656_v40 = vpop.permute.xlu0 %655 }
 0x199   : > { %3195 = vmatpush.xpose.msk.msra.mxu2 %vm474_vm2, %v656_v40 }
 0x19c   : > { %3196 = vmatmul.msk.f32.vlgmr.msra.gmra.mxu2 %vm474_vm2, %v443_v32 }
 0x1a0   : > { %v439_v41 = vpop.permute.xlu0 %438 }
 0x1a1   : > { %3192 = vmatmul.msk.f32.vlgmr.msra.gmra.mxu3 %vm474_vm2, %v439_v41 }
 0x1a8   : > { %v426_v44 = vpop.permute.xlu0 %425 }
 0x1a9   : > { %v4359_v45 = vadd.f32 %v426_v44, %v4317_v10  ;;  %v4362_v46 = vadd.f32 %v426_v44, %v4322_v12 }
 0x1ab   : > { %v4075_v47 = vpack.i.bf16 %v4362_v46, %v4359_v45  ;;  %v4080_v63 = vpack.i.bf16 %v4359_v45, %v4362_v46 }
 0x1b4   : > { %v522_v42 = vpop.f32.mrf.mxu2 }
 0x1b5   : > { %v684_v43 = vsel %vm474_vm2, %v522_v42, -inf }
 0x1b6   : > { %685 = vmax.xlane.f32.xlu0 %v684_v43 }
 0x1ca   : > { %4076 = vrot.lane.b32.xlu0 %v4075_v47, %s4209_s10 }
 0x1f9   : > { %v574_v57 = vpop.f32.mrf.mxu1 }
 0x1fa   : > { %v690_v58 = vsel %vm474_vm2, %v574_v57, -inf }
 0x202   : > { %v683_v48 = vpop.xlane.xlu1 %682 }
 0x203   : > { %v705_v49 = vsub.f32 %v496_v35, %v683_v48 }
 0x205   : > { %v713_v50 = vmul.f32 1.442695, %v705_v49 }
 0x207   : > { %4121 = vpow2.f32 %v713_v50 }
 0x20d   : > { %v4367_v51 = vpop.eup %4121 }
 0x20e   : > { %v600_v52 = vpop.f32.mrf.mxu2  ;;  %v729_v53 = vsel %vm474_vm2, %v4367_v51, 0.0 }
 0x20f   : > { %730 = vadd.xlane.f32.xlu0 %v729_v53  ;;  %v693_v54 = vsel %vm474_vm2, %v600_v52, -inf }
 0x210   : > { %v548_v55 = vpop.f32.mrf.mxu0  ;;  %694 = vmax.xlane.f32.xlu1 %v693_v54  ;;  %v652_v4 = vpop.f32.mrf.mxu1 }
 0x211   : > { %v687_v56 = vsel %vm474_vm2, %v548_v55, -inf  ;;  %v699_v7 = vsel %vm474_vm2, %v652_v4, -inf }
 0x212   : > { %688 = vmax.xlane.f32.xlu2 %v687_v56 }
 0x21a   : > { %691 = vmax.xlane.f32.xlu2 %v690_v58 }
 0x21f   : > { %v678_v59 = vpop.f32.mrf.mxu2 }
 0x220   : > { %v702_v60 = vsel %vm474_vm2, %v678_v59, -inf }
 0x222   : > { %703 = vmax.xlane.f32.xlu2 %v702_v60 }
 0x224   : > { %v626_v61 = vpop.f32.mrf.mxu3 }
 0x225   : > { %v696_v62 = vsel %vm474_vm2, %v626_v61, -inf }
 0x226   : > { %697 = vmax.xlane.f32.xlu0 %v696_v62 }
 0x229   : > { %4081 = vrot.lane.b32.xlu1 %v4080_v63, %s4210_s12  ;;  %v686_v0 = vpop.xlane.xlu0 %685 }
 0x22a   : > { %v706_v1 = vsub.f32 %v522_v42, %v686_v0 }
 0x22c   : > { %v715_v2 = vmul.f32 1.442695, %v706_v1 }
 0x22e   : > { %4123 = vpow2.f32 %v715_v2 }
 0x234   : > { %v4381_v8 = vpop.eup %4123 }
 0x235   : > { %v732_v9 = vsel %vm474_vm2, %v4381_v8, 0.0 }
 0x23a   : > { %4071 = vrot.lane.b32.xlu2 %v4080_v63, %s4208_s8 }
 0x23c   : > { %v4077_v33 = vpop.permute.xlu0 %4076 }
 0x23d   : > { %v4079_v49 = vunpack.i.h.bf16 %v4077_v33  ;;  %v4078_v53 = vunpack.i.l.bf16 %v4077_v33 }
 0x253   : > { %700 = vmax.xlane.f32.xlu1 %v699_v7 }
 0x25b   : > { %733 = vadd.xlane.f32.xlu1 %v732_v9 }
 0x282   : > { %v4403_v34 = vpop.xlane.xlu0 %730 }
 0x283   : > { %v695_v10 = vpop.xlane.xlu1 %694  ;;  %vm758_vm13 = vweird.f32 %v4403_v34 }
 0x284   : > { %v709_v11 = vsub.f32 %v600_v52, %v695_v10 }
 0x285   : > { %v689_v12 = vpop.xlane.xlu2 %688 }
 0x286   : > { %v721_v13 = vmul.f32 1.442695, %v709_v11  ;;  %v707_v14 = vsub.f32 %v548_v55, %v689_v12 }
 0x288   : > { %4125 = vpow2.f32 %v721_v13  ;;  %v717_v15 = vmul.f32 1.442695, %v707_v14 }
 0x28a   : > { %4127 = vpow2.f32 %v717_v15 }
 0x28d   : > { %v692_v16 = vpop.xlane.xlu2 %691 }
 0x28e   : > { %v4385_v17 = vpop.eup %4125  ;;  %v708_v18 = vsub.f32 %v574_v57, %v692_v16 }
 0x28f   : > { %v741_v19 = vsel %vm474_vm2, %v4385_v17, 0.0 }
 0x290   : > { %v4389_v20 = vpop.eup %4127  ;;  %v719_v21 = vmul.f32 1.442695, %v708_v18  ;;  %742 = vadd.xlane.f32.xlu2 %v741_v19 }
 0x291   : > { %v735_v22 = vsel %vm474_vm2, %v4389_v20, 0.0 }
 0x292   : > { %4129 = vpow2.f32 %v719_v21  ;;  %736 = vadd.xlane.f32.xlu0 %v735_v22 }
 0x295   : > { %v704_v23 = vpop.xlane.xlu2 %703 }
 0x296   : > { %v712_v24 = vsub.f32 %v678_v59, %v704_v23 }
 0x298   : > { %v4393_v25 = vpop.eup %4129  ;;  %v727_v26 = vmul.f32 1.442695, %v712_v24 }
 0x299   : > { %v738_v27 = vsel %vm474_vm2, %v4393_v25, 0.0  ;;  %v698_v37 = vpop.xlane.xlu0 %697 }
 0x29a   : > { %4131 = vpow2.f32 %v727_v26  ;;  %739 = vadd.xlane.f32.xlu2 %v738_v27  ;;  %v710_v38 = vsub.f32 %v626_v61, %v698_v37 }
 0x29b   : > { %v4082_v39 = vpop.permute.xlu1 %4081 }
 0x29c   : > { %v723_v40 = vmul.f32 1.442695, %v710_v38  ;;  %v4084_v48 = vunpack.i.h.bf16 %v4082_v39  ;;  %v4083_v52 = vunpack.i.l.bf16 %v4082_v39 }
 0x29d   : > { %v4072_v28 = vpop.permute.xlu2 %4071 }
 0x29e   : > { %v4074_v30 = vunpack.i.h.bf16 %v4072_v28  ;;  %v4073_v35 = vunpack.i.l.bf16 %v4072_v28  ;;  %4133 = vpow2.f32 %v723_v40  ;;  %v4100_v50 = vpack.i.bf16 %v4084_v48, %v4079_v49 }
 0x29f   : > { %v4095_v54 = vpack.i.bf16 %v4083_v52, %v4078_v53  ;;  %v762_v40 = vand.u32 2147483647, %v4403_v34 }
 0x2a0   : > { %v4397_v29 = vpop.eup %4131  ;;  %v4090_v32 = vpack.i.bf16 %v4074_v30, %v4362_v46  ;;  %v4085_v36 = vpack.i.bf16 %v4073_v35, %v4359_v45 }
 0x2a1   : > { %v750_v31 = vsel %vm474_vm2, %v4397_v29, 0.0 }
 0x2a2   : > { %751 = vadd.xlane.f32.xlu1 %v750_v31 }
 0x2a4   : > { %v4407_v44 = vpop.eup %4133 }
 0x2a5   : > { %v744_v46 = vsel %vm474_vm2, %v4407_v44, 0.0 }
 0x2a6   : > { %4091 = vrot.lane.b32.xlu0 %v4090_v32, %s4212_s15 }
 0x2bb   : > { %4086 = vrot.lane.b32.xlu1 %v4085_v36, %s4212_s15 }
 0x2c6   : > { %v701_v41 = vpop.xlane.xlu1 %700 }
 0x2c7   : > { %v711_v42 = vsub.f32 %v652_v4, %v701_v41 }
 0x2c9   : > { %v725_v43 = vmul.f32 1.442695, %v711_v42 }
 0x2cb   : > { %4135 = vpow2.f32 %v725_v43 }
 0x2ce   : > { %v734_v55 = vpop.xlane.xlu1 %733 }
 0x2cf   : > { %4137 = vrcp.f32 %v734_v55  ;;  %v779_v4 = vand.u32 2147483648, %v734_v55  ;;  %vm773_vm5 = vweird.f32 %v734_v55  ;;  %v777_v10 = vand.u32 2147483647, %v734_v55 }
 0x2d0   : > { %745 = vadd.xlane.f32.xlu0 %v744_v46 }
 0x2d1   : > { %v4411_v47 = vpop.eup %4135  ;;  %v780_v15 = vor.u32 1.1754944e-38, %v779_v4  ;;  %vm778_vm9 = vcmp.eq.f32.partialorder %v777_v10, 8.507059e+37 }
 0x2d2   : > { %v747_v45 = vsel %vm474_vm2, %v4411_v47, 0.0 }
 0x2d3   : > { %748 = vadd.xlane.f32.xlu2 %v747_v45 }
 0x2d5   : > { %v4138_v56 = vpop.eup %4137 }
 0x2d6   : > { %v769_v57 = vmul.f32 %v4138_v56, %v734_v55  ;;  %vm774_vm3 = vweird.f32 %v4138_v56 }
 0x2d7   : > { %vm775_vm6 = vmor %vm773_vm5, %vm774_vm3  ;;  %vm763_vm3 = vcmp.eq.f32.partialorder %v762_v40, 8.507059e+37 }
 0x2d8   : > { %v770_v60 = vsub.f32 1.0, %v769_v57 }
 0x2da   : > { %v771_v62 = vmul.f32 %v4138_v56, %v770_v60 }
 0x2dc   : > { %v772_v2 = vadd.f32 %v4138_v56, %v771_v62 }
 0x2de   : > { %v776_v13 = vsel %vm775_vm6, %v4138_v56, %v772_v2 }
 0x2df   : > { %v781_v21 = vsel %vm778_vm9, %v780_v15, %v776_v13 }
 0x2e0   : > { %v782_v30 = vmul.f32 %v4381_v8, %v781_v21  ;;  %v764_v8 = vand.u32 2147483648, %v4403_v34 }
 0x2e2   : > { %v765_v46 = vor.u32 1.1754944e-38, %v764_v8 }
 0x2e4   : > { %4101 = vrot.lane.b32.xlu0 %v4100_v50, %s4212_s15 }
 0x2eb   : > { %4096 = vrot.lane.b32.xlu2 %v4095_v54, %s4212_s15 }
 0x303   : > { %v4417_v58 = vpop.xlane.xlu2 %742 }
 0x304   : > { %v824_v2 = vand.u32 2147483648, %v4417_v58 }
 0x305   : > { %v737_v59 = vpop.xlane.xlu0 %736 }
 0x306   : > { %4139 = vrcp.f32 %v737_v59  ;;  %v794_v9 = vand.u32 2147483648, %v737_v59  ;;  %v792_v11 = vand.u32 2147483647, %v737_v59  ;;  %vm788_vm7 = vweird.f32 %v737_v59 }
 0x307   : > { %4141 = vrcp.f32 %v4403_v34  ;;  %v825_v13 = vor.u32 1.1754944e-38, %v824_v2 }
 0x308   : > { %v795_v18 = vor.u32 1.1754944e-38, %v794_v9  ;;  %vm793_vm10 = vcmp.eq.f32.partialorder %v792_v11, 8.507059e+37 }
 0x30c   : > { %v4140_v61 = vpop.eup %4139 }
 0x30d   : > { %v784_v63 = vmul.f32 %v4140_v61, %v737_v59  ;;  %v740_v0 = vpop.xlane.xlu2 %739  ;;  %vm789_vm4 = vweird.f32 %v4140_v61  ;;  %v4142_v14 = vpop.eup %4141 }
 0x30e   : > { %4143 = vrcp.f32 %v740_v0  ;;  %vm790_vm8 = vmor %vm788_vm7, %vm789_vm4  ;;  %v754_v24 = vmul.f32 %v4142_v14, %v4403_v34  ;;  %vm759_vm11 = vweird.f32 %v4142_v14  ;;  %vm803_vm15 = vweird.f32 %v740_v0 }
 0x30f   : > { %v785_v1 = vsub.f32 1.0, %v784_v63  ;;  %vm760_vm14 = vmor %vm758_vm13, %vm759_vm11  ;;  %v807_v41 = vand.u32 2147483647, %v740_v0  ;;  %4145 = vrcp.f32 %v4417_v58  ;;  %vm818_vm7 = vweird.f32 %v4417_v58 }
 0x310   : > { %v755_v32 = vsub.f32 1.0, %v754_v24 }
 0x311   : > { %v786_v7 = vmul.f32 %v4140_v61, %v785_v1  ;;  %vm808_vm4 = vcmp.eq.f32.partialorder %v807_v41, 8.507059e+37 }
 0x312   : > { %v756_v35 = vmul.f32 %v4142_v14, %v755_v32 }
 0x313   : > { %v787_v12 = vadd.f32 %v4140_v61, %v786_v7  ;;  %v822_v7 = vand.u32 2147483647, %v4417_v58 }
 0x314   : > { %v4144_v19 = vpop.eup %4143  ;;  %v757_v37 = vadd.f32 %v4142_v14, %v756_v35 }
 0x315   : > { %v791_v16 = vsel %vm790_vm8, %v4140_v61, %v787_v12  ;;  %v799_v26 = vmul.f32 %v4144_v19, %v740_v0  ;;  %vm804_vm12 = vweird.f32 %v4144_v19  ;;  %v752_v39 = vpop.xlane.xlu1 %751  ;;  %v4146_v34 = vpop.eup %4145  ;;  %vm823_vm11 = vcmp.eq.f32.partialorder %v822_v7, 8.507059e+37 }
 0x316   : > { %v796_v22 = vsel %vm793_vm10, %v795_v18, %v791_v16  ;;  %vm805_vm0 = vmor %vm803_vm15, %vm804_vm12  ;;  %v761_v43 = vsel %vm760_vm14, %v4142_v14, %v757_v37  ;;  %4147 = vrcp.f32 %v752_v39  ;;  %v814_v57 = vmul.f32 %v4146_v34, %v4417_v58 }
 0x317   : > { %v797_v31 = vmul.f32 %v4389_v20, %v796_v22  ;;  %v800_v33 = vsub.f32 1.0, %v799_v26  ;;  %v809_v20 = vand.u32 2147483648, %v740_v0  ;;  %v766_v49 = vsel %vm763_vm3, %v765_v46, %v761_v43 }
 0x318   : > { %v4092_v23 = vpop.permute.xlu0 %4091  ;;  %v767_v54 = vmul.f32 %v4367_v51, %v766_v49  ;;  %v815_v60 = vsub.f32 1.0, %v814_v57  ;;  %vm819_vm5 = vweird.f32 %v4146_v34  ;;  %v869_v4 = vand.u32 2147483648, %v752_v39  ;;  %v3883_v57 = vld [vmem:[%s4277_s11 + $0x8] sm:$0xff] }
 0x319   : > { %v4094_v27 = vunpack.i.h.bf16 %v4092_v23  ;;  %v4093_v28 = vunpack.i.l.bf16 %v4092_v23  ;;  %v801_v36 = vmul.f32 %v4144_v19, %v800_v33  ;;  %v810_v45 = vor.u32 1.1754944e-38, %v809_v20  ;;  %vm820_vm8 = vmor %vm818_vm7, %vm819_vm5 }
 0x31a   : > { %v816_v62 = vmul.f32 %v4146_v34, %v815_v60  ;;  %vm863_vm9 = vweird.f32 %v752_v39  ;;  %v867_v9 = vand.u32 2147483647, %v752_v39  ;;  %v870_v14 = vor.u32 1.1754944e-38, %v869_v4 }
 0x31b   : > { %920 = vmatpush.msra.mxu0 %v4093_v28  ;;  %946 = vmatpush.msrb.mxu1 %v4094_v27  ;;  %v802_v38 = vadd.f32 %v4144_v19, %v801_v36  ;;  %vm1107_vm7 = vcmask 130048  }
 0x31c   : > { %3198 = vmatmul.msk.f32.vlgmr.msra.gmra.mxu0 %vm474_vm2, %v782_v30  ;;  %3199 = vmatmul.msk.f32.vlgmr.msrb.gmra.mxu1 %vm474_vm2, %v797_v31  ;;  %v4148_v56 = vpop.eup %4147  ;;  %vm868_vm12 = vcmp.eq.f32.partialorder %v867_v9, 8.507059e+37 }
 0x31d   : > { %v806_v42 = vsel %vm805_vm0, %v4144_v19, %v802_v38  ;;  %v859_v59 = vmul.f32 %v4148_v56, %v752_v39  ;;  %vm864_vm6 = vweird.f32 %v4148_v56 }
 0x31e   : > { %v811_v48 = vsel %vm808_vm4, %v810_v45, %v806_v42  ;;  %vm865_vm10 = vmor %vm863_vm9, %vm864_vm6 }
 0x31f   : > { %v812_v55 = vmul.f32 %v4393_v25, %v811_v48  ;;  %v860_v61 = vsub.f32 1.0, %v859_v59  ;;  %v817_v25 = vadd.f32 %v4146_v34, %v816_v62  ;;  %v3882_v59 = vld [vmem:[%s4277_s11] sm:$0xff] }
 0x321   : > { %v861_v51 = vmul.f32 %v4148_v56, %v860_v61  ;;  %v821_v11 = vsel %vm820_vm8, %v4146_v34, %v817_v25  ;;  %vm1110_vm8 = vcmask 195584  }
 0x322   : > { %v826_v18 = vsel %vm823_vm11, %v825_v13, %v821_v11 }
 0x323   : > { %v862_v0 = vadd.f32 %v4148_v56, %v861_v51  ;;  %v827_v31 = vmul.f32 %v4385_v17, %v826_v18 }
 0x325   : > { %v866_v12 = vsel %vm865_vm10, %v4148_v56, %v862_v0 }
 0x326   : > { %v871_v19 = vsel %vm868_vm12, %v870_v14, %v866_v12  ;;  %v1118_v14 = vperm.slane %v4307_v3, 3 }
 0x327   : > { %v872_v32 = vmul.f32 %v4397_v29, %v871_v19 }
 0x32d   : > { %v4087_v50 = vpop.permute.xlu1 %4086 }
 0x32e   : > { %v4089_v52 = vunpack.i.h.bf16 %v4087_v50  ;;  %v4088_v53 = vunpack.i.l.bf16 %v4087_v50 }
 0x330   : > { %894 = vmatpush.msrb.mxu3 %v4088_v53  ;;  %972 = vmatpush.msrb.mxu2 %v4089_v52 }
 0x331   : > { %3197 = vmatmul.msk.f32.vlgmr.msrb.gmra.mxu3 %vm474_vm2, %v767_v54  ;;  %3200 = vmatmul.msk.f32.vlgmr.msrb.gmra.mxu2 %vm474_vm2, %v812_v55 }
 0x343   : > { %v746_v63 = vpop.xlane.xlu0 %745 }
 0x344   : > { %4149 = vrcp.f32 %v746_v63  ;;  %v839_v22 = vand.u32 2147483648, %v746_v63  ;;  %v837_v28 = vand.u32 2147483647, %v746_v63  ;;  %vm833_vm14 = vweird.f32 %v746_v63 }
 0x346   : > { %v749_v1 = vpop.xlane.xlu2 %748  ;;  %v840_v39 = vor.u32 1.1754944e-38, %v839_v22  ;;  %vm838_vm3 = vcmp.eq.f32.partialorder %v837_v28, 8.507059e+37 }
 0x347   : > { %4151 = vrcp.f32 %v749_v1  ;;  %v854_v35 = vand.u32 2147483648, %v749_v1  ;;  %v852_v37 = vand.u32 2147483647, %v749_v1  ;;  %vm848_vm4 = vweird.f32 %v749_v1 }
 0x349   : > { %v855_v29 = vor.u32 1.1754944e-38, %v854_v35  ;;  %vm853_vm6 = vcmp.eq.f32.partialorder %v852_v37, 8.507059e+37 }
 0x34a   : > { %v4150_v10 = vpop.eup %4149 }
 0x34b   : > { %v829_v15 = vmul.f32 %v4150_v10, %v746_v63  ;;  %vm834_vm13 = vweird.f32 %v4150_v10 }
 0x34c   : > { %vm835_vm15 = vmor %vm833_vm14, %vm834_vm13 }
 0x34d   : > { %v4152_v16 = vpop.eup %4151  ;;  %v830_v21 = vsub.f32 1.0, %v829_v15 }
 0x34e   : > { %v844_v23 = vmul.f32 %v4152_v16, %v749_v1  ;;  %v4097_v24 = vpop.permute.xlu2 %4096  ;;  %vm849_vm0 = vweird.f32 %v4152_v16 }
 0x34f   : > { %v831_v26 = vmul.f32 %v4150_v10, %v830_v21  ;;  %v4099_v58 = vunpack.i.h.bf16 %v4097_v24  ;;  %v4098_v27 = vunpack.i.l.bf16 %v4097_v24  ;;  %vm850_vm5 = vmor %vm848_vm4, %vm849_vm0 }
 0x350   : > { %v845_v30 = vsub.f32 1.0, %v844_v23 }
 0x351   : > { %v832_v33 = vadd.f32 %v4150_v10, %v831_v26  ;;  %998 = vmatpush.msra.mxu3 %v4098_v27  ;;  %1076 = vmatpush.msra.mxu2 %v4099_v58  ;;  %v4216_v26 = vmov 32.0  }
 0x352   : > { %v846_v36 = vmul.f32 %v4152_v16, %v845_v30  ;;  %3201 = vmatmul.msk.f32.vlgmr.msra.gmra.mxu3 %vm474_vm2, %v827_v31  ;;  %3204 = vmatmul.msk.f32.vlgmr.msra.gmra.mxu2 %vm474_vm2, %v872_v32  ;;  %4153 = vrcp.f32 %v4216_v26 }
 0x353   : > { %v836_v38 = vsel %vm835_vm15, %v4150_v10, %v832_v33  ;;  %1140 = vmatpush.bf16.msrb.mxu3 %v3883_v57  ;;  %v3224_v57 = vld [vmem:[%s4282_s14 + $0x8] sm:$0xf] }
 0x354   : > { %v847_v8 = vadd.f32 %v4152_v16, %v846_v36  ;;  %v841_v17 = vsel %vm838_vm3, %v840_v39, %v836_v38 }
 0x355   : > { %v842_v46 = vmul.f32 %v4407_v44, %v841_v17  ;;  %v3280_v17 = vld [vmem:[%s4282_s14 + $0x80] sm:$0xf] }
 0x356   : > { %v851_v20 = vsel %vm850_vm5, %v4152_v16, %v847_v8  ;;  %v4102_v40 = vpop.permute.xlu0 %4101 }
 0x357   : > { %v856_v41 = vsel %vm853_vm6, %v855_v29, %v851_v20  ;;  %v4104_v42 = vunpack.i.h.bf16 %v4102_v40  ;;  %v4103_v43 = vunpack.i.l.bf16 %v4102_v40  ;;  %1141 = vmatpush.bf16.msrb.mxu3 %v3882_v59  ;;  %v3908_v29 = vld [vmem:[%s4282_s14 + $0xbc] sm:$0xf0]  ;;  %v3900_v20 = vld [vmem:[%s4282_s14 + $0x84] sm:$0xf] }
 0x358   : > { %v857_v45 = vmul.f32 %v4411_v47, %v856_v41  ;;  %v4154_v58 = vpop.eup %4153  ;;  %v3281_v41 = vor.u32 %v3908_v29, %v3280_v17 }
 0x359   : > { %1024 = vmatpush.msrb.mxu0 %v4103_v43  ;;  %1050 = vmatpush.msra.mxu1 %v4104_v42  ;;  %v1157_v27 = vmul.f32 32.0, %v4154_v58  ;;  %v3282_v42 = vld [vmem:[%s4282_s14 + $0xc0] sm:$0xf0]  ;;  %v3288_v43 = vld [vmem:[%s4282_s14 + $0x88] sm:$0xf] }
 0x35a   : > { %3202 = vmatmul.msk.f32.vlgmr.msrb.gmra.mxu0 %vm474_vm2, %v842_v46  ;;  %3203 = vmatmul.msk.f32.vlgmr.msra.gmra.mxu1 %vm474_vm2, %v857_v45  ;;  %v3909_v46 = vld [vmem:[%s4282_s14 + $0xc4] sm:$0xf0] }
 0x35b   : > { %v1158_v28 = vsub.f32 1.0, %v1157_v27  ;;  %1445 = vmatpush.bf16.msra.mxu0 %v3281_v41  ;;  %v3240_v27 = vld [vmem:[%s4282_s14 + $0x18] sm:$0xf] }
 0x35d   : > { %v1159_v3 = vmul.f32 %v4154_v58, %v1158_v28  ;;  %v3895_v28 = vld [vmem:[%s4282_s14 + $0x54] sm:$0xf0] }
 0x35f   : > { %v1160_v30 = vadd.f32 %v4154_v58, %v1159_v3 }
 0x399   : > { %v948_v48 = vpop.f32.mrf.mxu1  ;;  %v922_v53 = vpop.f32.mrf.mxu0 }
 0x3b4   : > { %v974_v49 = vpop.f32.mrf.mxu2  ;;  %v896_v52 = vpop.f32.mrf.mxu3 }
 0x3b5   : > { %v4105_v50 = vpack.i.bf16 %v974_v49, %v948_v48  ;;  %v3285_v48 = vor.u32 %v3900_v20, %v3282_v42  ;;  %v3289_v49 = vor.u32 %v3909_v46, %v3288_v43  ;;  %v4509_v42 = vld [vmem:[%s4292_s21] sm:$0xff] }
 0x3b6   : > { %v1201_v43 = vperm.slane %v4509_v42, 5 }
 0x3b7   : > { %4106 = vrot.lane.b32.xlu1 %v4105_v50, %s4213_s16  ;;  %v3901_v50 = vld [vmem:[%s4282_s14 + $0x8c] sm:$0xf]  ;;  %1459 = vmatpush.bf16.msrb.mxu1 %v3285_v48 }
 0x3b8   : > { %1473 = vmatpush.bf16.msrb.mxu2 %v3289_v49  ;;  %v1204_v49 = vperm.slane %v4509_v42, 6 }
 0x3d5   : > { %v1000_v54 = vpop.f32.mrf.mxu3  ;;  %v1078_v55 = vpop.f32.mrf.mxu2 }
 0x3d7   : > { %v1026_v44 = vpop.f32.mrf.mxu0  ;;  %v1052_v34 = vpop.f32.mrf.mxu1 }
 0x3d8   : > { %v4110_v47 = vpack.i.bf16 %v1026_v44, %v1000_v54  ;;  %v4115_v56 = vpack.i.bf16 %v1078_v55, %v1052_v34  ;;  %v3216_v55 = vld [vmem:[%s4282_s14] sm:$0xf] }
 0x3d9   : > { %v3892_v44 = vld [vmem:[%s4282_s14 + $0x3c] sm:$0xf0] }
 0x3da   : > { %4116 = vrot.lane.b32.xlu0 %v4115_v56, %s4214_s17  ;;  %4111 = vrot.lane.b32.xlu2 %v4110_v47, %s4215_s19  ;;  %v3217_v34 = vor.u32 %v3892_v44, %v3216_v55  ;;  %v3884_v47 = vld [vmem:[%s4282_s14 + $0x4] sm:$0xf]  ;;  %v3912_v55 = vld [vmem:[%s4282_s14 + $0xdc] sm:$0xf0] }
 0x3db   : > { %v3218_v56 = vld [vmem:[%s4282_s14 + $0x40] sm:$0xf0] }
 0x3dc   : > { %v3221_v59 = vor.u32 %v3884_v47, %v3218_v56  ;;  %1446 = vmatpush.bf16.msra.mxu0 %v3217_v34  ;;  %v3904_v44 = vld [vmem:[%s4282_s14 + $0xa4] sm:$0xf]  ;;  %v3320_v34 = vld [vmem:[%s4282_s14 + $0xa8] sm:$0xf] }
 0x3de   : > { %1460 = vmatpush.bf16.msrb.mxu1 %v3221_v59  ;;  %v3905_v59 = vld [vmem:[%s4282_s14 + $0xac] sm:$0xf] }
 0x429   : > { %v4107_v60 = vpop.permute.xlu1 %4106 }
 0x42a   : > { %v4109_v62 = vunpack.i.h.bf16 %v4107_v60  ;;  %v4108_v51 = vunpack.i.l.bf16 %v4107_v60  ;;  %v3893_v60 = vld [vmem:[%s4282_s14 + $0x44] sm:$0xf0] }
 0x42c   : > { %v1106_v1 = vsel %vm474_vm2, %v922_v53, %v4109_v62  ;;  %v1105_v2 = vsel %vm474_vm2, %v896_v52, %v4108_v51  ;;  %vm1161_vm2 = vweird.f32 %v4154_v58  ;;  %v3290_v52 = vld [vmem:[%s4282_s14 + $0xc8] sm:$0xf0]  ;;  %v3225_v51 = vor.u32 %v3893_v60, %v3224_v57  ;;  %v3913_v57 = vld [vmem:[%s4282_s14 + $0xe4] sm:$0xf0] }
 0x42d   : > { %v3293_v53 = vor.u32 %v3901_v50, %v3290_v52  ;;  %v3226_v62 = vld [vmem:[%s4282_s14 + $0x48] sm:$0xf0] }
 0x42e   : > { %1474 = vmatpush.bf16.msrb.mxu2 %v3225_v51  ;;  %v3248_v51 = vld [vmem:[%s4282_s14 + $0x20] sm:$0xf] }
 0x42f   : > { %1487 = vmatpush.bf16.msra.mxu3 %v3293_v53 }
 0x434   : > { %v4112_v61 = vpop.permute.xlu2 %4111 }
 0x435   : > { %v4114_v63 = vunpack.i.h.bf16 %v4112_v61  ;;  %v4113_v25 = vunpack.i.l.bf16 %v4112_v61  ;;  %v3885_v61 = vld [vmem:[%s4282_s14 + $0xc] sm:$0xf] }
 0x437   : > { %v1109_v9 = vsel %vm1107_vm7, %v1106_v1, %v4114_v63  ;;  %v1108_v10 = vsel %vm1107_vm7, %v1105_v2, %v4113_v25  ;;  %v3229_v63 = vor.u32 %v3885_v61, %v3226_v62  ;;  %v3910_v1 = vld [vmem:[%s4282_s14 + $0xcc] sm:$0xf0]  ;;  %v3902_v2 = vld [vmem:[%s4282_s14 + $0x94] sm:$0xf] }
 0x439   : > { %1488 = vmatpush.bf16.msra.mxu3 %v3229_v63  ;;  %v3896_v63 = vld [vmem:[%s4282_s14 + $0x5c] sm:$0xf0] }
 0x44c   : > { %v4117_v0 = vpop.permute.xlu0 %4116 }
 0x44d   : > { %v4119_v4 = vunpack.i.h.bf16 %v4117_v0  ;;  %v4118_v7 = vunpack.i.l.bf16 %v4117_v0  ;;  %v3296_v0 = vld [vmem:[%s4282_s14 + $0x90] sm:$0xf] }
 0x44f   : > { %v1111_v11 = vsel %vm1110_vm8, %v1108_v10, %v4118_v7  ;;  %v1112_v12 = vsel %vm1110_vm8, %v1109_v9, %v4119_v4  ;;  %v3297_v7 = vor.u32 %v3910_v1, %v3296_v0  ;;  %v3298_v9 = vld [vmem:[%s4282_s14 + $0xd0] sm:$0xf0]  ;;  %v3304_v10 = vld [vmem:[%s4282_s14 + $0x98] sm:$0xf]  ;;  %v3888_v1 = vld [vmem:[%s4282_s14 + $0x24] sm:$0xf] }
 0x450   : > { %v1113_v13 = vpack.c.bf16 %v1112_v12, %v1111_v11  ;;  %v3911_v11 = vld [vmem:[%s4282_s14 + $0xd4] sm:$0xf0]  ;;  %v3301_v12 = vor.u32 %v3902_v2, %v3298_v9  ;;  %v3250_v2 = vld [vmem:[%s4282_s14 + $0x60] sm:$0xf0]  ;;  %v3889_v9 = vld [vmem:[%s4282_s14 + $0x2c] sm:$0xf] }
 0x451   : > { %1501 = vmatpush.bf16.msrb.mxu0 %v3297_v7  ;;  %v3897_v7 = vld [vmem:[%s4282_s14 + $0x64] sm:$0xf0] }
 0x452   : > { %3213 = vmatmul.msk.bf16.vlgmr.msrb.gmra.mxu3 %vm393_vm1, %v1113_v13  ;;  %v3305_v13 = vor.u32 %v3911_v11, %v3304_v10  ;;  %1515 = vmatpush.bf16.msra.mxu1 %v3301_v12  ;;  %v3258_v10 = vld [vmem:[%s4282_s14 + $0x68] sm:$0xf0]  ;;  %v3249_v11 = vor.u32 %v3896_v63, %v3248_v51  ;;  %v3253_v12 = vor.u32 %v3888_v1, %v3250_v2  ;;  %v3926_v51 = vld [vmem:[%s4287_s18 + $0x50] sm:$0xff] }
 0x453   : > { %v3934_v63 = vld [vmem:[%s4287_s18 + $0x90] sm:$0xff]  ;;  %v3933_v1 = vld [vmem:[%s4287_s18 + $0x88] sm:$0xff] }
 0x454   : > { %1529 = vmatpush.bf16.msra.mxu2 %v3305_v13  ;;  %v3941_v2 = vld [vmem:[%s4287_s18 + $0xc8] sm:$0xff] }
 0x4d5   : > { %v1143_v15 = vpop.f32.mrf.mxu3 }
 0x4d6   : > { %v1144_v16 = vadd.f32 %v1143_v15, %v1118_v14  ;;  %v3306_v15 = vld [vmem:[%s4282_s14 + $0xd8] sm:$0xf0] }
 0x4d8   : > { %v1148_v18 = vadd.f32 %v1144_v16, %v4309_v5  ;;  %v4455_v5 = vsel %vm1161_vm2, %v4154_v58, %v1160_v30  ;;  %v3232_v16 = vld [vmem:[%s4282_s14 + $0x10] sm:$0xf]  ;;  %v3234_v58 = vld [vmem:[%s4282_s14 + $0x50] sm:$0xf0]  ;;  %v3241_v30 = vor.u32 %v3895_v28, %v3240_v27 }
 0x4d9   : > { %v3264_v27 = vld [vmem:[%s4282_s14 + $0x30] sm:$0xf] }
 0x4da   : > { %v1150_v19 = vsel %vm393_vm1, %v1148_v18, 0.0  ;;  %1530 = vmatpush.bf16.msra.mxu2 %v3241_v30  ;;  %v3898_v28 = vld [vmem:[%s4282_s14 + $0x6c] sm:$0xf0] }
 0x4db   : > { %1151 = vadd.xlane.f32.xlu1 %v1150_v19 }
 0x4dd   : > { %v1145_v21 = vpop.f32.mrf.mxu3 }
 0x4de   : > { %v1146_v22 = vadd.f32 %v1145_v21, %v1118_v14  ;;  %v3903_v14 = vld [vmem:[%s4282_s14 + $0x9c] sm:$0xf] }
 0x4df   : > { %v3309_v21 = vor.u32 %v3903_v14, %v3306_v15  ;;  %v3261_v14 = vor.u32 %v3889_v9, %v3258_v10  ;;  %v3328_v15 = vld [vmem:[%s4282_s14 + $0xb0] sm:$0xf]  ;;  %v3955_v9 = vld [vmem:[%s4287_s18 + $0x138] sm:$0xff] }
 0x4e0   : > { %v1149_v23 = vadd.f32 %v1146_v22, %v4311_v6  ;;  %v3894_v22 = vld [vmem:[%s4282_s14 + $0x4c] sm:$0xf0]  ;;  %v3963_v10 = vld [vmem:[%s4287_s18 + $0x178] sm:$0xff] }
 0x4e1   : > { %v3233_v26 = vor.u32 %v3894_v22, %v3232_v16  ;;  %1543 = vmatpush.bf16.msrb.mxu3 %v3309_v21  ;;  %v3914_v16 = vld [vmem:[%s4282_s14 + $0xec] sm:$0xf0]  ;;  %v3336_v21 = vld [vmem:[%s4282_s14 + $0xb8] sm:$0xf] }
 0x4e2   : > { %v1153_v24 = vsel %vm393_vm1, %v1149_v23, 0.0  ;;  %v3915_v22 = vld [vmem:[%s4282_s14 + $0xf4] sm:$0xf0] }
 0x4e3   : > { %1154 = vadd.xlane.f32.xlu2 %v1153_v24  ;;  %1502 = vmatpush.bf16.msrb.mxu0 %v3233_v26  ;;  %v3329_v26 = vor.u32 %v3914_v16, %v3328_v15  ;;  %v3954_v15 = vld [vmem:[%s4287_s18 + $0x130] sm:$0xff] }
 0x4e4   : > { %v3962_v16 = vld [vmem:[%s4287_s18 + $0x170] sm:$0xff] }
 0x54e   : > { %v1152_v31 = vpop.xlane.xlu1 %1151 }
 0x54f   : > { %v1163_v32 = vmul.f32 %v4455_v5, %v1152_v31  ;;  %v3887_v31 = vld [vmem:[%s4282_s14 + $0x1c] sm:$0xf] }
 0x551   : > { %v4458_v6 = vsub.f32 %v1148_v18, %v1163_v32  ;;  %v3242_v32 = vld [vmem:[%s4282_s14 + $0x58] sm:$0xf0] }
 0x553   : > { %v1167_v33 = vmul.f32 %v4458_v6, %v4458_v6 }
 0x555   : > { %v1169_v35 = vsel %vm393_vm1, %v1167_v33, 0.0 }
 0x556   : > { %v1155_v36 = vpop.xlane.xlu2 %1154  ;;  %1170 = vadd.xlane.f32.xlu0 %v1169_v35  ;;  %v3245_v35 = vor.u32 %v3887_v31, %v3242_v32  ;;  %v3890_v31 = vld [vmem:[%s4282_s14 + $0x34] sm:$0xf] }
 0x557   : > { %v1164_v37 = vmul.f32 %v4455_v5, %v1155_v36  ;;  %v3266_v32 = vld [vmem:[%s4282_s14 + $0x70] sm:$0xf0] }
 0x558   : > { %1544 = vmatpush.bf16.msrb.mxu3 %v3245_v35  ;;  %v3899_v35 = vld [vmem:[%s4282_s14 + $0x74] sm:$0xf0] }
 0x559   : > { %v4464_v38 = vsub.f32 %v1149_v23, %v1164_v37  ;;  %v3886_v23 = vld [vmem:[%s4282_s14 + $0x14] sm:$0xf] }
 0x55a   : > { %v3237_v3 = vor.u32 %v3886_v23, %v3234_v58  ;;  %v3907_v23 = vld [vmem:[%s4282_s14 + $0xbc] sm:$0xf] }
 0x55b   : > { %v1168_v39 = vmul.f32 %v4464_v38, %v4464_v38 }
 0x55c   : > { %1516 = vmatpush.bf16.msra.mxu1 %v3237_v3  ;;  %v3337_v3 = vor.u32 %v3915_v22, %v3336_v21  ;;  %v3953_v21 = vld [vmem:[%s4287_s18 + $0x128] sm:$0xff] }
 0x55d   : > { %v1172_v8 = vsel %vm393_vm1, %v1168_v39, 0.0  ;;  %v3961_v22 = vld [vmem:[%s4287_s18 + $0x168] sm:$0xff] }
 0x55e   : > { %1173 = vadd.xlane.f32.xlu1 %v1172_v8 }
 0x5c9   : > { %v1171_v40 = vpop.xlane.xlu0 %1170 }
 0x5ca   : > { %v1175_v45 = vmul.f32 %v1171_v40, %v4455_v5 }
 0x5cc   : > { %v4478_v54 = vadd.f32 1e-05, %v1175_v45 }
 0x5ce   : > { %4155 = vrsqrt.f32 %v4478_v54  ;;  %vm1185_vm10 = vweird.f32 %v4478_v54 }
 0x5d1   : > { %v1174_v25 = vpop.xlane.xlu1 %1173 }
 0x5d2   : > { %v1176_v4 = vmul.f32 %v1174_v25, %v4455_v5  ;;  %v3321_v25 = vor.u32 %v3913_v57, %v3320_v34  ;;  %v3944_v34 = vld [vmem:[%s4287_s18 + $0xe0] sm:$0xff]  ;;  %v3919_v57 = vld [vmem:[%s4287_s18 + $0x18] sm:$0xff] }
 0x5d4   : > { %v4156_v18 = vpop.eup %4155  ;;  %v1178_v19 = vadd.f32 1e-05, %v1176_v4  ;;  %v3256_v4 = vld [vmem:[%s4282_s14 + $0x28] sm:$0xf] }
 0x5d5   : > { %v1180_v24 = vmul.f32 %v4156_v18, %v4478_v54  ;;  %vm1186_vm9 = vweird.f32 %v4156_v18  ;;  %v3312_v54 = vld [vmem:[%s4282_s14 + $0xa0] sm:$0xf]  ;;  %v3257_v13 = vor.u32 %v3897_v7, %v3256_v4 }
 0x5d6   : > { %4157 = vrsqrt.f32 %v1178_v19  ;;  %vm1187_vm11 = vmor %vm1185_vm10, %vm1186_vm9  ;;  %vm1195_vm13 = vweird.f32 %v1178_v19  ;;  %v3313_v61 = vor.u32 %v3912_v55, %v3312_v54  ;;  %v3945_v54 = vld [vmem:[%s4287_s18 + $0xe8] sm:$0xff]  ;;  %v3920_v55 = vld [vmem:[%s4287_s18 + $0x20] sm:$0xff] }
 0x5d7   : > { %v1181_v33 = vmul.f32 %v4156_v18, %v1180_v24  ;;  %v3338_v24 = vld [vmem:[%s4282_s14 + $0xf8] sm:$0xf0]  ;;  %v3916_v4 = vld [vmem:[%s4287_s18] sm:$0xff] }
 0x5d8   : > { %v3341_v30 = vor.u32 %v3907_v23, %v3338_v24  ;;  %v3924_v7 = vld [vmem:[%s4287_s18 + $0x40] sm:$0xff] }
 0x5d9   : > { %v1182_v36 = vmul.f32 0.5, %v1181_v33  ;;  %v3272_v33 = vld [vmem:[%s4282_s14 + $0x38] sm:$0xf]  ;;  %v3952_v23 = vld [vmem:[%s4287_s18 + $0x120] sm:$0xff] }
 0x5da   : > { %v3960_v24 = vld [vmem:[%s4287_s18 + $0x160] sm:$0xff] }
 0x5db   : > { %v1183_v37 = vsub.f32 1.5, %v1182_v36  ;;  %v3891_v36 = vld [vmem:[%s4282_s14 + $0x3c] sm:$0xf] }
 0x5dc   : > { %v4158_v39 = vpop.eup %4157 }
 0x5dd   : > { %v1184_v8 = vmul.f32 %v4156_v18, %v1183_v37  ;;  %v1190_v17 = vmul.f32 %v4158_v39, %v1178_v19  ;;  %vm1196_vm12 = vweird.f32 %v4158_v39  ;;  %v3330_v19 = vld [vmem:[%s4282_s14 + $0xf0] sm:$0xf0]  ;;  %v3274_v37 = vld [vmem:[%s4282_s14 + $0x78] sm:$0xf0] }
 0x5de   : > { %vm1197_vm14 = vmor %vm1195_vm13, %vm1196_vm12 }
 0x5df   : > { %v1191_v29 = vmul.f32 %v4158_v39, %v1190_v17  ;;  %v1188_v20 = vsel %vm1187_vm11, %v4156_v18, %v1184_v8  ;;  %v3906_v18 = vld [vmem:[%s4282_s14 + $0xb4] sm:$0xf]  ;;  %v3269_v8 = vor.u32 %v3890_v31, %v3266_v32  ;;  %v3273_v17 = vor.u32 %v3899_v35, %v3272_v33  ;;  %v3967_v33 = vld [vmem:[%s4287_s18 + $0x198] sm:$0xff] }
 0x5e0   : > { %v1199_v46 = vmul.f32 %v1188_v20, %v4458_v6  ;;  %v3314_v6 = vld [vmem:[%s4282_s14 + $0xe0] sm:$0xf0]  ;;  %v3333_v58 = vor.u32 %v3906_v18, %v3330_v19  ;;  %v3923_v20 = vld [vmem:[%s4287_s18 + $0x38] sm:$0xff]  ;;  %v3970_v18 = vld [vmem:[%s4287_s18 + $0x1b0] sm:$0xff] }
 0x5e1   : > { %v1192_v40 = vmul.f32 0.5, %v1191_v29  ;;  %v3317_v62 = vor.u32 %v3904_v44, %v3314_v6  ;;  %v3277_v29 = vor.u32 %v3891_v36, %v3274_v37  ;;  %v3928_v44 = vld [vmem:[%s4287_s18 + $0x60] sm:$0xff]  ;;  %v3978_v19 = vld [vmem:[%s4287_s18 + $0x1f0] sm:$0xff]  ;;  %v3975_v35 = vld [vmem:[%s4287_s18 + $0x1d8] sm:$0xff] }
 0x5e2   : > { %v1202_v50 = vmul.f32 %v1201_v43, %v1199_v46  ;;  %v3922_v46 = vld [vmem:[%s4287_s18 + $0x30] sm:$0xff]  ;;  %v3936_v6 = vld [vmem:[%s4287_s18 + $0xa0] sm:$0xff]  ;;  %v3949_v36 = vld [vmem:[%s4287_s18 + $0x108] sm:$0xff] }
 0x5e3   : > { %v1193_v41 = vsub.f32 1.5, %v1192_v40  ;;  %v3931_v40 = vld [vmem:[%s4287_s18 + $0x78] sm:$0xff]  ;;  %v3950_v31 = vld [vmem:[%s4287_s18 + $0x110] sm:$0xff]  ;;  %v3957_v37 = vld [vmem:[%s4287_s18 + $0x148] sm:$0xff] }
 0x5e4   : > { %v4520_v47 = vadd.f32 %v1204_v49, %v1202_v50  ;;  %v3921_v50 = vld [vmem:[%s4287_s18 + $0x28] sm:$0xff]  ;;  %v3958_v32 = vld [vmem:[%s4287_s18 + $0x150] sm:$0xff] }
 0x5e5   : > { %v1194_v45 = vmul.f32 %v4158_v39, %v1193_v41  ;;  %v3939_v41 = vld [vmem:[%s4287_s18 + $0xb8] sm:$0xff] }
 0x5e7   : > { %v1198_v48 = vsel %vm1197_vm14, %v4158_v39, %v1194_v45  ;;  %v3265_v39 = vor.u32 %v3898_v28, %v3264_v27  ;;  %v3930_v45 = vld [vmem:[%s4287_s18 + $0x70] sm:$0xff]  ;;  %v3951_v27 = vld [vmem:[%s4287_s18 + $0x118] sm:$0xff] }
 0x5e8   : > { %v1200_v52 = vmul.f32 %v1198_v48, %v4464_v38  ;;  %v3322_v38 = vld [vmem:[%s4282_s14 + $0xe8] sm:$0xf0]  ;;  %v3938_v48 = vld [vmem:[%s4287_s18 + $0xb0] sm:$0xff]  ;;  %v3959_v28 = vld [vmem:[%s4287_s18 + $0x158] sm:$0xff] }
 0x5e9   : > { %v3325_v0 = vor.u32 %v3905_v59, %v3322_v38  ;;  %v3927_v59 = vld [vmem:[%s4287_s18 + $0x58] sm:$0xff] }
 0x5ea   : > { %v1203_v53 = vmul.f32 %v1201_v43, %v1200_v52  ;;  %v3947_v43 = vld [vmem:[%s4287_s18 + $0xf8] sm:$0xff]  ;;  %v3929_v52 = vld [vmem:[%s4287_s18 + $0x68] sm:$0xff] }
 0x5eb   : > { %v3935_v38 = vld [vmem:[%s4287_s18 + $0x98] sm:$0xff] }
 0x5ec   : > { %v4522_v56 = vadd.f32 %v1204_v49, %v1203_v53  ;;  %v3946_v49 = vld [vmem:[%s4287_s18 + $0xf0] sm:$0xff]  ;;  %v3937_v53 = vld [vmem:[%s4287_s18 + $0xa8] sm:$0xff] }
 0x5ee   : > { %v4529_v60 = vpack.c.bf16 %v4522_v56, %v4520_v47 }
 0x5f0   : > { %3342 = vmatmul.msk.bf16.vlgmr.msra.gmra.mxu0 %vm393_vm1, %v4529_v60  ;;  %3343 = vmatmul.msk.bf16.vlgmr.msrb.gmra.mxu1 %vm393_vm1, %v4529_v60 }
 0x5f1   : > { %3344 = vmatmul.msk.bf16.vlgmr.msrb.gmra.mxu2 %vm393_vm1, %v4529_v60  ;;  %3345 = vmatmul.msk.bf16.vlgmr.msra.gmra.mxu3 %vm393_vm1, %v4529_v60 }
 0x5f2   : > { %1557 = vmatpush.bf16.msra.mxu0 %v3313_v61  ;;  %1571 = vmatpush.bf16.msrb.mxu1 %v3317_v62  ;;  %v3943_v61 = vld [vmem:[%s4287_s18 + $0xd8] sm:$0xff]  ;;  %v3918_v62 = vld [vmem:[%s4287_s18 + $0x10] sm:$0xff] }
 0x5f3   : > { %1585 = vmatpush.bf16.msrb.mxu2 %v3321_v25  ;;  %1599 = vmatpush.bf16.msra.mxu3 %v3325_v0  ;;  %v3942_v25 = vld [vmem:[%s4287_s18 + $0xd0] sm:$0xff]  ;;  %v3917_v0 = vld [vmem:[%s4287_s18 + $0x8] sm:$0xff] }
 0x5f6   : > { %1558 = vmatpush.bf16.msra.mxu0 %v3249_v11  ;;  %1572 = vmatpush.bf16.msrb.mxu1 %v3253_v12  ;;  %v3932_v11 = vld [vmem:[%s4287_s18 + $0x80] sm:$0xff] }
 0x5f7   : > { %1586 = vmatpush.bf16.msrb.mxu2 %v3257_v13  ;;  %1600 = vmatpush.bf16.msra.mxu3 %v3261_v14  ;;  %v3940_v12 = vld [vmem:[%s4287_s18 + $0xc0] sm:$0xff]  ;;  %v3971_v13 = vld [vmem:[%s4287_s18 + $0x1b8] sm:$0xff] }
 0x5f8   : > { %v3979_v14 = vld [vmem:[%s4287_s18 + $0x1f8] sm:$0xff] }
 0x600   : > { %3346 = vmatmul.msk.bf16.vlgmr.msrb.gmra.mxu0 %vm393_vm1, %v4529_v60  ;;  %3347 = vmatmul.msk.bf16.vlgmr.msra.gmra.mxu1 %vm393_vm1, %v4529_v60 }
 0x601   : > { %3348 = vmatmul.msk.bf16.vlgmr.msra.gmra.mxu2 %vm393_vm1, %v4529_v60  ;;  %3349 = vmatmul.msk.bf16.vlgmr.msrb.gmra.mxu3 %vm393_vm1, %v4529_v60 }
 0x602   : > { %1613 = vmatpush.bf16.msrb.mxu0 %v3329_v26  ;;  %1627 = vmatpush.bf16.msra.mxu1 %v3333_v58  ;;  %v3969_v26 = vld [vmem:[%s4287_s18 + $0x1a8] sm:$0xff] }
 0x603   : > { %1641 = vmatpush.bf16.msra.mxu2 %v3337_v3  ;;  %1655 = vmatpush.bf16.msrb.mxu3 %v3341_v30  ;;  %v3977_v58 = vld [vmem:[%s4287_s18 + $0x1e8] sm:$0xff]  ;;  %v3968_v3 = vld [vmem:[%s4287_s18 + $0x1a0] sm:$0xff] }
 0x604   : > { %v3976_v30 = vld [vmem:[%s4287_s18 + $0x1e0] sm:$0xff] }
 0x606   : > { %1614 = vmatpush.bf16.msrb.mxu0 %v3265_v39  ;;  %1628 = vmatpush.bf16.msra.mxu1 %v3269_v8  ;;  %v3966_v39 = vld [vmem:[%s4287_s18 + $0x190] sm:$0xff] }
 0x607   : > { %1642 = vmatpush.bf16.msra.mxu2 %v3273_v17  ;;  %1656 = vmatpush.bf16.msrb.mxu3 %v3277_v29  ;;  %v3974_v8 = vld [vmem:[%s4287_s18 + $0x1d0] sm:$0xff]  ;;  %v3948_v17 = vld [vmem:[%s4287_s18 + $0x100] sm:$0xff] }
 0x608   : > { %v3956_v29 = vld [vmem:[%s4287_s18 + $0x140] sm:$0xff] }
 0x610   : > { %3350 = vmatmul.msk.bf16.vlgmr.msra.gmra.mxu0 %vm393_vm1, %v4529_v60  ;;  %3351 = vmatmul.msk.bf16.vlgmr.msrb.gmra.mxu1 %vm393_vm1, %v4529_v60 }
 0x611   : > { %3352 = vmatmul.msk.bf16.vlgmr.msrb.gmra.mxu2 %vm393_vm1, %v4529_v60  ;;  %3353 = vmatmul.msk.bf16.vlgmr.msra.gmra.mxu3 %vm393_vm1, %v4529_v60 }
 0x612   : > { %2736 = vmatpush.bf16.msra.mxu0 %v3923_v20  ;;  %2750 = vmatpush.bf16.msrb.mxu1 %v3931_v40  ;;  %v3965_v20 = vld [vmem:[%s4287_s18 + $0x188] sm:$0xff] }
 0x613   : > { %2764 = vmatpush.bf16.msrb.mxu2 %v3939_v41  ;;  %2778 = vmatpush.bf16.msra.mxu3 %v3947_v43  ;;  %v3973_v40 = vld [vmem:[%s4287_s18 + $0x1c8] sm:$0xff]  ;;  %v3964_v41 = vld [vmem:[%s4287_s18 + $0x180] sm:$0xff] }
 0x614   : > { %v3972_v43 = vld [vmem:[%s4287_s18 + $0x1c0] sm:$0xff] }
 0x616   : > { %2737 = vmatpush.bf16.msra.mxu0 %v3922_v46  ;;  %2751 = vmatpush.bf16.msrb.mxu1 %v3930_v45  ;;  %v4652_v46 = vld [vmem:[%s4297_s29] sm:$0xff] }
 0x617   : > { %2765 = vmatpush.bf16.msrb.mxu2 %v3938_v48  ;;  %2779 = vmatpush.bf16.msra.mxu3 %v3946_v49  ;;  %v1244_v49 = vperm.slane %v4652_v46, 0 }
 0x61a   : > { %2738 = vmatpush.bf16.msra.mxu0 %v3921_v50  ;;  %2752 = vmatpush.bf16.msrb.mxu1 %v3929_v52  ;;  %v1245_v50 = vperm.slane %v4652_v46, 1 }
 0x61b   : > { %2766 = vmatpush.bf16.msrb.mxu2 %v3937_v53  ;;  %2780 = vmatpush.bf16.msra.mxu3 %v3945_v54 }
 0x61e   : > { %2739 = vmatpush.bf16.msra.mxu0 %v3920_v55  ;;  %2753 = vmatpush.bf16.msrb.mxu1 %v3928_v44 }
 0x61f   : > { %2767 = vmatpush.bf16.msrb.mxu2 %v3936_v6  ;;  %2781 = vmatpush.bf16.msra.mxu3 %v3944_v34 }
 0x620   : > { %3354 = vmatmul.msk.bf16.vlgmr.msrb.gmra.mxu0 %vm393_vm1, %v4529_v60  ;;  %3355 = vmatmul.msk.bf16.vlgmr.msra.gmra.mxu1 %vm393_vm1, %v4529_v60 }
 0x621   : > { %3356 = vmatmul.msk.bf16.vlgmr.msra.gmra.mxu2 %vm393_vm1, %v4529_v60  ;;  %3357 = vmatmul.msk.bf16.vlgmr.msrb.gmra.mxu3 %vm393_vm1, %v4529_v60  ;;  %v3925_v60 = vld [vmem:[%s4287_s18 + $0x48] sm:$0xff] }
 0x622   : > { %2740 = vmatpush.bf16.msra.mxu0 %v3919_v57  ;;  %2754 = vmatpush.bf16.msrb.mxu1 %v3927_v59  ;;  %v1246_v59 = vperm.slane %v4652_v46, 2 }
 0x623   : > { %2768 = vmatpush.bf16.msrb.mxu2 %v3935_v38  ;;  %2782 = vmatpush.bf16.msra.mxu3 %v3943_v61  ;;  %v1247_v38 = vperm.slane %v4652_v46, 3 }
 0x626   : > { %2741 = vmatpush.bf16.msra.mxu0 %v3918_v62  ;;  %2755 = vmatpush.bf16.msrb.mxu1 %v3926_v51 }
 0x627   : > { %2769 = vmatpush.bf16.msrb.mxu2 %v3934_v63  ;;  %2783 = vmatpush.bf16.msra.mxu3 %v3942_v25  ;;  %v3987_v25 = vld [vmem:[%s4287_s18 + $0x238] sm:$0xff] }
 0x62a   : > { %2742 = vmatpush.bf16.msra.mxu0 %v3917_v0  ;;  %2756 = vmatpush.bf16.msrb.mxu1 %v3925_v60  ;;  %v3995_v0 = vld [vmem:[%s4287_s18 + $0x278] sm:$0xff] }
 0x62b   : > { %2770 = vmatpush.bf16.msrb.mxu2 %v3933_v1  ;;  %2784 = vmatpush.bf16.msra.mxu3 %v3941_v2 }
 0x62e   : > { %2743 = vmatpush.bf16.msra.mxu0 %v3916_v4  ;;  %2757 = vmatpush.bf16.msrb.mxu1 %v3924_v7 }
 0x62f   : > { %2771 = vmatpush.bf16.msrb.mxu2 %v3932_v11  ;;  %2785 = vmatpush.bf16.msra.mxu3 %v3940_v12 }
 0x632   : > { %2792 = vmatpush.bf16.msrb.mxu0 %v3955_v9  ;;  %2806 = vmatpush.bf16.msra.mxu1 %v3963_v10 }
 0x633   : > { %2820 = vmatpush.bf16.msra.mxu2 %v3971_v13  ;;  %2834 = vmatpush.bf16.msrb.mxu3 %v3979_v14  ;;  %v3986_v14 = vld [vmem:[%s4287_s18 + $0x230] sm:$0xff] }
 0x636   : > { %2793 = vmatpush.bf16.msrb.mxu0 %v3954_v15  ;;  %2807 = vmatpush.bf16.msra.mxu1 %v3962_v16  ;;  %v3994_v15 = vld [vmem:[%s4287_s18 + $0x270] sm:$0xff] }
 0x637   : > { %2821 = vmatpush.bf16.msra.mxu2 %v3970_v18  ;;  %2835 = vmatpush.bf16.msrb.mxu3 %v3978_v19 }
 0x63a   : > { %2794 = vmatpush.bf16.msrb.mxu0 %v3953_v21  ;;  %2808 = vmatpush.bf16.msra.mxu1 %v3961_v22  ;;  %v1248_v22 = vperm.slane %v4652_v46, 4 }
 0x63b   : > { %2822 = vmatpush.bf16.msra.mxu2 %v3969_v26  ;;  %2836 = vmatpush.bf16.msrb.mxu3 %v3977_v58  ;;  %v4011_v26 = vld [vmem:[%s4287_s18 + $0x2f8] sm:$0xff] }
 0x63e   : > { %2795 = vmatpush.bf16.msrb.mxu0 %v3952_v23  ;;  %2809 = vmatpush.bf16.msra.mxu1 %v3960_v24  ;;  %v1249_v23 = vperm.slane %v4652_v46, 5  ;;  %v4003_v24 = vld [vmem:[%s4287_s18 + $0x2b8] sm:$0xff] }
 0x63f   : > { %2823 = vmatpush.bf16.msra.mxu2 %v3968_v3  ;;  %2837 = vmatpush.bf16.msrb.mxu3 %v3976_v30  ;;  %v3993_v3 = vld [vmem:[%s4287_s18 + $0x268] sm:$0xff] }
 0x642   : > { %2796 = vmatpush.bf16.msrb.mxu0 %v3951_v27  ;;  %2810 = vmatpush.bf16.msra.mxu1 %v3959_v28  ;;  %v3985_v28 = vld [vmem:[%s4287_s18 + $0x228] sm:$0xff] }
 0x643   : > { %2824 = vmatpush.bf16.msra.mxu2 %v3967_v33  ;;  %2838 = vmatpush.bf16.msrb.mxu3 %v3975_v35  ;;  %v4002_v35 = vld [vmem:[%s4287_s18 + $0x2b0] sm:$0xff] }
 0x646   : > { %2797 = vmatpush.bf16.msrb.mxu0 %v3950_v31  ;;  %2811 = vmatpush.bf16.msra.mxu1 %v3958_v32 }
 0x647   : > { %2825 = vmatpush.bf16.msra.mxu2 %v3966_v39  ;;  %2839 = vmatpush.bf16.msrb.mxu3 %v3974_v8  ;;  %v3984_v8 = vld [vmem:[%s4287_s18 + $0x220] sm:$0xff] }
 0x64a   : > { %2798 = vmatpush.bf16.msrb.mxu0 %v3949_v36  ;;  %2812 = vmatpush.bf16.msra.mxu1 %v3957_v37  ;;  %v4010_v36 = vld [vmem:[%s4287_s18 + $0x2f0] sm:$0xff] }
 0x64b   : > { %2826 = vmatpush.bf16.msra.mxu2 %v3965_v20  ;;  %2840 = vmatpush.bf16.msrb.mxu3 %v3973_v40  ;;  %v1250_v40 = vperm.slane %v4652_v46, 6 }
 0x64e   : > { %2799 = vmatpush.bf16.msrb.mxu0 %v3948_v17  ;;  %2813 = vmatpush.bf16.msra.mxu1 %v3956_v29  ;;  %v3992_v17 = vld [vmem:[%s4287_s18 + $0x260] sm:$0xff] }
 0x64f   : > { %2827 = vmatpush.bf16.msra.mxu2 %v3964_v41  ;;  %2841 = vmatpush.bf16.msrb.mxu3 %v3972_v43  ;;  %v1251_v41 = vperm.slane %v4652_v46, 7 }
 0x66d   : > { %v1448_v45 = vpop.f32.mrf.mxu0  ;;  %v1462_v48 = vpop.f32.mrf.mxu1 }
 0x66e   : > { %v1449_v52 = vadd.f32 %v1448_v45, %v1244_v49  ;;  %v1463_v53 = vadd.f32 %v1462_v48, %v1245_v50 }
 0x670   : > { %v1663_v61 = vmax.f32 %v1449_v52, 0.0  ;;  %v1664_v62 = vmax.f32 %v1463_v53, 0.0  ;;  %v4009_v52 = vld [vmem:[%s4287_s18 + $0x2e8] sm:$0xff] }
 0x674   : > { %v1476_v54 = vpop.f32.mrf.mxu2  ;;  %v1490_v55 = vpop.f32.mrf.mxu3 }
 0x675   : > { %v1450_v44 = vpop.f32.mrf.mxu0  ;;  %v1464_v6 = vpop.f32.mrf.mxu1  ;;  %v1477_v2 = vadd.f32 %v1476_v54, %v1246_v59  ;;  %v1491_v4 = vadd.f32 %v1490_v55, %v1247_v38  ;;  %v3983_v55 = vld [vmem:[%s4287_s18 + $0x218] sm:$0xff] }
 0x676   : > { %v1451_v34 = vadd.f32 %v1450_v44, %v1244_v49  ;;  %v1465_v57 = vadd.f32 %v1464_v6, %v1245_v50  ;;  %v4001_v50 = vld [vmem:[%s4287_s18 + $0x2a8] sm:$0xff]  ;;  %v3991_v44 = vld [vmem:[%s4287_s18 + $0x258] sm:$0xff] }
 0x677   : > { %v1665_v16 = vmax.f32 %v1477_v2, 0.0  ;;  %v1666_v18 = vmax.f32 %v1491_v4, 0.0 }
 0x678   : > { %v1679_v51 = vmax.f32 %v1451_v34, 0.0  ;;  %v1680_v63 = vmax.f32 %v1465_v57, 0.0 }
 0x67a   : > { %v1695_v60 = vpack.c.bf16 %v1679_v51, %v1663_v61  ;;  %v1696_v1 = vpack.c.bf16 %v1680_v63, %v1664_v62  ;;  %v4681_v51 = vld [vmem:[%s4297_s29 + $0x8] sm:$0xff] }
 0x67c   : > { %v1478_v7 = vpop.f32.mrf.mxu2  ;;  %v1492_v9 = vpop.f32.mrf.mxu3  ;;  %2744 = vmatmul.bf16.vlgmr.msra.gmra.mxu0 %v1695_v60  ;;  %2758 = vmatmul.bf16.vlgmr.msrb.gmra.mxu1 %v1696_v1  ;;  %v3990_v60 = vld [vmem:[%s4287_s18 + $0x250] sm:$0xff] }
 0x67d   : > { %v1479_v10 = vadd.f32 %v1478_v7, %v1246_v59  ;;  %v1493_v11 = vadd.f32 %v1492_v9, %v1247_v38  ;;  %2848 = vmatpush.bf16.msra.mxu0 %v3987_v25  ;;  %2862 = vmatpush.bf16.msrb.mxu1 %v3995_v0  ;;  %v1504_v12 = vpop.f32.mrf.mxu0  ;;  %v1518_v13 = vpop.f32.mrf.mxu1  ;;  %v4000_v59 = vld [vmem:[%s4287_s18 + $0x2a0] sm:$0xff]  ;;  %v3982_v0 = vld [vmem:[%s4287_s18 + $0x210] sm:$0xff]  ;;  %v1252_v9 = vperm.slane %v4681_v51, 0 }
 0x67e   : > { %v1505_v30 = vadd.f32 %v1504_v12, %v1248_v22  ;;  %v1519_v31 = vadd.f32 %v1518_v13, %v1249_v23  ;;  %v4008_v38 = vld [vmem:[%s4287_s18 + $0x2e0] sm:$0xff]  ;;  %v4007_v12 = vld [vmem:[%s4287_s18 + $0x2d8] sm:$0xff] }
 0x67f   : > { %v1681_v19 = vmax.f32 %v1479_v10, 0.0  ;;  %v1682_v21 = vmax.f32 %v1493_v11, 0.0  ;;  %v1253_v10 = vperm.slane %v4681_v51, 1  ;;  %v3999_v11 = vld [vmem:[%s4287_s18 + $0x298] sm:$0xff] }
 0x680   : > { %v1667_v43 = vmax.f32 %v1505_v30, 0.0  ;;  %v1668_v45 = vmax.f32 %v1519_v31, 0.0  ;;  %v3988_v30 = vld [vmem:[%s4287_s18 + $0x240] sm:$0xff]  ;;  %v1254_v31 = vperm.slane %v4681_v51, 2 }
 0x681   : > { %v1697_v58 = vpack.c.bf16 %v1681_v19, %v1665_v16  ;;  %v1698_v27 = vpack.c.bf16 %v1682_v21, %v1666_v18  ;;  %2849 = vmatpush.bf16.msra.mxu0 %v3986_v14  ;;  %2863 = vmatpush.bf16.msrb.mxu1 %v3994_v15  ;;  %v3981_v15 = vld [vmem:[%s4287_s18 + $0x208] sm:$0xff] }
 0x682   : > { %v3989_v16 = vld [vmem:[%s4287_s18 + $0x248] sm:$0xff] }
 0x683   : > { %2772 = vmatmul.bf16.vlgmr.msrb.gmra.mxu2 %v1697_v58  ;;  %2786 = vmatmul.bf16.vlgmr.msra.gmra.mxu3 %v1698_v27 }
 0x684   : > { %2876 = vmatpush.bf16.msrb.mxu2 %v4003_v24  ;;  %2890 = vmatpush.bf16.msra.mxu3 %v4011_v26  ;;  %v1532_v32 = vpop.f32.mrf.mxu2  ;;  %v1546_v33 = vpop.f32.mrf.mxu3  ;;  %v4006_v24 = vld [vmem:[%s4287_s18 + $0x2d0] sm:$0xff] }
 0x685   : > { %2850 = vmatpush.bf16.msra.mxu0 %v3985_v28  ;;  %2864 = vmatpush.bf16.msrb.mxu1 %v3993_v3  ;;  %v1506_v37 = vpop.f32.mrf.mxu0  ;;  %v1520_v39 = vpop.f32.mrf.mxu1  ;;  %v1533_v6 = vadd.f32 %v1532_v32, %v1250_v40  ;;  %v1547_v34 = vadd.f32 %v1546_v33, %v1251_v41  ;;  %v3980_v3 = vld [vmem:[%s4287_s18 + $0x200] sm:$0xff]  ;;  %v1255_v32 = vperm.slane %v4681_v51, 3  ;;  %v4019_v33 = vld [vmem:[%s4287_s18 + $0x338] sm:$0xff] }
 0x686   : > { %v1507_v29 = vadd.f32 %v1506_v37, %v1248_v22  ;;  %v1521_v20 = vadd.f32 %v1520_v39, %v1249_v23  ;;  %v3998_v23 = vld [vmem:[%s4287_s18 + $0x290] sm:$0xff] }
 0x687   : > { %v1669_v1 = vmax.f32 %v1533_v6, 0.0  ;;  %v1670_v2 = vmax.f32 %v1547_v34, 0.0  ;;  %v4043_v6 = vld [vmem:[%s4287_s18 + $0x3f8] sm:$0xff] }
 0x688   : > { %v1683_v48 = vmax.f32 %v1507_v29, 0.0  ;;  %v1684_v49 = vmax.f32 %v1521_v20, 0.0  ;;  %2877 = vmatpush.bf16.msrb.mxu2 %v4002_v35  ;;  %2891 = vmatpush.bf16.msra.mxu3 %v4010_v36  ;;  %v4027_v35 = vld [vmem:[%s4287_s18 + $0x378] sm:$0xff]  ;;  %v4005_v29 = vld [vmem:[%s4287_s18 + $0x2c8] sm:$0xff] }
 0x689   : > { %2851 = vmatpush.bf16.msra.mxu0 %v3984_v8  ;;  %2865 = vmatpush.bf16.msrb.mxu1 %v3992_v17  ;;  %v3997_v17 = vld [vmem:[%s4287_s18 + $0x288] sm:$0xff] }
 0x68a   : > { %v1699_v53 = vpack.c.bf16 %v1683_v48, %v1667_v43  ;;  %v1700_v54 = vpack.c.bf16 %v1684_v49, %v1668_v45  ;;  %v4018_v45 = vld [vmem:[%s4287_s18 + $0x330] sm:$0xff] }
 0x68b   : > { %v4026_v48 = vld [vmem:[%s4287_s18 + $0x370] sm:$0xff] }
 0x68c   : > { %2878 = vmatpush.bf16.msrb.mxu2 %v4001_v50  ;;  %2892 = vmatpush.bf16.msra.mxu3 %v4009_v52  ;;  %v1534_v46 = vpop.f32.mrf.mxu2  ;;  %v1548_v57 = vpop.f32.mrf.mxu3  ;;  %v3996_v52 = vld [vmem:[%s4287_s18 + $0x280] sm:$0xff] }
 0x68d   : > { %v1535_v61 = vadd.f32 %v1534_v46, %v1250_v40  ;;  %v1549_v62 = vadd.f32 %v1548_v57, %v1251_v41  ;;  %2800 = vmatmul.bf16.vlgmr.msrb.gmra.mxu0 %v1699_v53  ;;  %2814 = vmatmul.bf16.vlgmr.msra.gmra.mxu1 %v1700_v54  ;;  %v1560_v63 = vpop.f32.mrf.mxu0  ;;  %v1574_v25 = vpop.f32.mrf.mxu1  ;;  %v4004_v53 = vld [vmem:[%s4287_s18 + $0x2c0] sm:$0xff] }
 0x68e   : > { %2852 = vmatpush.bf16.msra.mxu0 %v3983_v55  ;;  %2866 = vmatpush.bf16.msrb.mxu1 %v3991_v44  ;;  %v1561_v18 = vadd.f32 %v1560_v63, %v1252_v9  ;;  %v1575_v19 = vadd.f32 %v1574_v25, %v1253_v10  ;;  %v4035_v44 = vld [vmem:[%s4287_s18 + $0x3b8] sm:$0xff]  ;;  %v4034_v25 = vld [vmem:[%s4287_s18 + $0x3b0] sm:$0xff] }
 0x68f   : > { %v1685_v4 = vmax.f32 %v1535_v61, 0.0  ;;  %v1686_v7 = vmax.f32 %v1549_v62, 0.0  ;;  %v4025_v61 = vld [vmem:[%s4287_s18 + $0x368] sm:$0xff] }
 0x690   : > { %2879 = vmatpush.bf16.msrb.mxu2 %v4000_v59  ;;  %2893 = vmatpush.bf16.msra.mxu3 %v4008_v38  ;;  %v1671_v36 = vmax.f32 %v1561_v18, 0.0  ;;  %v1672_v37 = vmax.f32 %v1575_v19, 0.0  ;;  %v4017_v38 = vld [vmem:[%s4287_s18 + $0x328] sm:$0xff]  ;;  %v4022_v18 = vld [vmem:[%s4287_s18 + $0x350] sm:$0xff] }
 0x691   : > { %v1701_v13 = vpack.c.bf16 %v1685_v4, %v1669_v1  ;;  %v1702_v14 = vpack.c.bf16 %v1686_v7, %v1670_v2  ;;  %v4016_v2 = vld [vmem:[%s4287_s18 + $0x320] sm:$0xff]  ;;  %v4033_v7 = vld [vmem:[%s4287_s18 + $0x3a8] sm:$0xff] }
 0x692   : > { %2853 = vmatpush.bf16.msra.mxu0 %v3982_v0  ;;  %2867 = vmatpush.bf16.msrb.mxu1 %v3990_v60  ;;  %v4042_v0 = vld [vmem:[%s4287_s18 + $0x3f0] sm:$0xff]  ;;  %v4024_v4 = vld [vmem:[%s4287_s18 + $0x360] sm:$0xff] }
 0x693   : > { %2828 = vmatmul.bf16.vlgmr.msra.gmra.mxu2 %v1701_v13  ;;  %2842 = vmatmul.bf16.vlgmr.msrb.gmra.mxu3 %v1702_v14  ;;  %v4032_v14 = vld [vmem:[%s4287_s18 + $0x3a0] sm:$0xff] }
 0x694   : > { %2880 = vmatpush.bf16.msrb.mxu2 %v3999_v11  ;;  %2894 = vmatpush.bf16.msra.mxu3 %v4007_v12  ;;  %v1588_v21 = vpop.f32.mrf.mxu2  ;;  %v1602_v22 = vpop.f32.mrf.mxu3  ;;  %v4023_v11 = vld [vmem:[%s4287_s18 + $0x358] sm:$0xff] }
 0x695   : > { %v1562_v26 = vpop.f32.mrf.mxu0  ;;  %v1576_v58 = vpop.f32.mrf.mxu1  ;;  %v1589_v41 = vadd.f32 %v1588_v21, %v1254_v31  ;;  %v1603_v43 = vadd.f32 %v1602_v22, %v1255_v32  ;;  %v4031_v22 = vld [vmem:[%s4287_s18 + $0x398] sm:$0xff] }
 0x696   : > { %2854 = vmatpush.bf16.msra.mxu0 %v3981_v15  ;;  %2868 = vmatpush.bf16.msrb.mxu1 %v3989_v16  ;;  %v1563_v27 = vadd.f32 %v1562_v26, %v1252_v9  ;;  %v1577_v28 = vadd.f32 %v1576_v58, %v1253_v10  ;;  %v4041_v9 = vld [vmem:[%s4287_s18 + $0x3e8] sm:$0xff]  ;;  %v4015_v10 = vld [vmem:[%s4287_s18 + $0x318] sm:$0xff]  ;;  %v4040_v15 = vld [vmem:[%s4287_s18 + $0x3e0] sm:$0xff]  ;;  %v1257_v26 = vperm.slane %v4681_v51, 5 }
 0x697   : > { %v1673_v34 = vmax.f32 %v1589_v41, 0.0  ;;  %v1674_v46 = vmax.f32 %v1603_v43, 0.0  ;;  %v4014_v16 = vld [vmem:[%s4287_s18 + $0x310] sm:$0xff]  ;;  %v4013_v58 = vld [vmem:[%s4287_s18 + $0x308] sm:$0xff] }
 0x698   : > { %v1687_v39 = vmax.f32 %v1563_v27, 0.0  ;;  %v1688_v8 = vmax.f32 %v1577_v28, 0.0  ;;  %2881 = vmatpush.bf16.msrb.mxu2 %v3998_v23  ;;  %2895 = vmatpush.bf16.msra.mxu3 %v4006_v24  ;;  %v4039_v23 = vld [vmem:[%s4287_s18 + $0x3d8] sm:$0xff]  ;;  %v1256_v24 = vperm.slane %v4681_v51, 4  ;;  %v4021_v27 = vld [vmem:[%s4287_s18 + $0x348] sm:$0xff] }
 0x699   : > { %v4037_v41 = vld [vmem:[%s4287_s18 + $0x3c8] sm:$0xff] }
 0x69a   : > { %v1703_v20 = vpack.c.bf16 %v1687_v39, %v1671_v36  ;;  %v1704_v40 = vpack.c.bf16 %v1688_v8, %v1672_v37  ;;  %2855 = vmatpush.bf16.msra.mxu0 %v3980_v3  ;;  %2869 = vmatpush.bf16.msrb.mxu1 %v3988_v30  ;;  %v4030_v30 = vld [vmem:[%s4287_s18 + $0x390] sm:$0xff]  ;;  %v4012_v37 = vld [vmem:[%s4287_s18 + $0x300] sm:$0xff]  ;;  %v1258_v8 = vperm.slane %v4681_v51, 6 }
 0x69b   : > { %v4020_v39 = vld [vmem:[%s4287_s18 + $0x340] sm:$0xff] }
 0x69c   : > { %2882 = vmatpush.bf16.msrb.mxu2 %v3997_v17  ;;  %2896 = vmatpush.bf16.msra.mxu3 %v4005_v29  ;;  %v1590_v49 = vpop.f32.mrf.mxu2  ;;  %v1604_v50 = vpop.f32.mrf.mxu3  ;;  %v1259_v17 = vperm.slane %v4681_v51, 7  ;;  %v4028_v51 = vld [vmem:[%s4287_s18 + $0x380] sm:$0xff] }
 0x69d   : > { %v1591_v54 = vadd.f32 %v1590_v49, %v1254_v31  ;;  %v1605_v55 = vadd.f32 %v1604_v50, %v1255_v32  ;;  %2856 = vmatmul.bf16.vlgmr.msra.gmra.mxu0 %v1703_v20  ;;  %2870 = vmatmul.bf16.vlgmr.msrb.gmra.mxu1 %v1704_v40  ;;  %v1616_v60 = vpop.f32.mrf.mxu0  ;;  %v1630_v1 = vpop.f32.mrf.mxu1  ;;  %v4038_v31 = vld [vmem:[%s4287_s18 + $0x3d0] sm:$0xff]  ;;  %v4029_v40 = vld [vmem:[%s4287_s18 + $0x388] sm:$0xff] }
 0x69e   : > { %2904 = vmatpush.bf16.msrb.mxu0 %v4019_v33  ;;  %2918 = vmatpush.bf16.msra.mxu1 %v4027_v35  ;;  %v1617_v32 = vadd.f32 %v1616_v60, %v1256_v24  ;;  %v1631_v33 = vadd.f32 %v1630_v1, %v1257_v26  ;;  %v1967_v60 = vperm.slane %v4509_v42, 4 }
 0x69f   : > { %v1689_v57 = vmax.f32 %v1591_v54, 0.0  ;;  %v1690_v59 = vmax.f32 %v1605_v55, 0.0  ;;  %v4036_v55 = vld [vmem:[%s4287_s18 + $0x3c0] sm:$0xff] }
 0x6a0   : > { %2883 = vmatpush.bf16.msrb.mxu2 %v3996_v52  ;;  %2897 = vmatpush.bf16.msra.mxu3 %v4004_v53  ;;  %v1675_v43 = vmax.f32 %v1617_v32, 0.0 }
 0x6a1   : > { %v1705_v62 = vpack.c.bf16 %v1689_v57, %v1673_v34  ;;  %v1706_v63 = vpack.c.bf16 %v1690_v59, %v1674_v46 }
 0x6a2   : > { %2905 = vmatpush.bf16.msrb.mxu0 %v4018_v45  ;;  %2919 = vmatpush.bf16.msra.mxu1 %v4026_v48  ;;  %v1676_v45 = vmax.f32 %v1631_v33, 0.0 }
 0x6a3   : > { %2884 = vmatmul.bf16.vlgmr.msrb.gmra.mxu2 %v1705_v62  ;;  %2898 = vmatmul.bf16.vlgmr.msra.gmra.mxu3 %v1706_v63 }
 0x6a4   : > { %2932 = vmatpush.bf16.msra.mxu2 %v4035_v44  ;;  %2946 = vmatpush.bf16.msrb.mxu3 %v4043_v6  ;;  %v1644_v12 = vpop.f32.mrf.mxu2  ;;  %v1658_v13 = vpop.f32.mrf.mxu3 }
 0x6a5   : > { %v1618_v19 = vpop.f32.mrf.mxu0  ;;  %v1632_v21 = vpop.f32.mrf.mxu1  ;;  %v1645_v50 = vadd.f32 %v1644_v12, %v1258_v8  ;;  %v1659_v52 = vadd.f32 %v1658_v13, %v1259_v17 }
 0x6a6   : > { %2906 = vmatpush.bf16.msrb.mxu0 %v4017_v38  ;;  %2920 = vmatpush.bf16.msra.mxu1 %v4025_v61  ;;  %v1619_v28 = vadd.f32 %v1618_v19, %v1256_v24  ;;  %v1633_v3 = vadd.f32 %v1632_v21, %v1257_v26 }
 0x6a7   : > { %v1677_v34 = vmax.f32 %v1645_v50, 0.0  ;;  %v1678_v46 = vmax.f32 %v1659_v52, 0.0 }
 0x6a8   : > { %2933 = vmatpush.bf16.msra.mxu2 %v4034_v25  ;;  %2947 = vmatpush.bf16.msrb.mxu3 %v4042_v0  ;;  %v1691_v29 = vmax.f32 %v1619_v28, 0.0  ;;  %v1692_v20 = vmax.f32 %v1633_v3, 0.0 }
 0x6aa   : > { %2907 = vmatpush.bf16.msrb.mxu0 %v4016_v2  ;;  %2921 = vmatpush.bf16.msra.mxu1 %v4024_v4  ;;  %v1707_v53 = vpack.c.bf16 %v1691_v29, %v1675_v43  ;;  %v1708_v54 = vpack.c.bf16 %v1692_v20, %v1676_v45 }
 0x6ac   : > { %2934 = vmatpush.bf16.msra.mxu2 %v4033_v7  ;;  %2948 = vmatpush.bf16.msrb.mxu3 %v4041_v9  ;;  %v1646_v35 = vpop.f32.mrf.mxu2  ;;  %v1660_v36 = vpop.f32.mrf.mxu3 }
 0x6ad   : > { %v1647_v48 = vadd.f32 %v1646_v35, %v1258_v8  ;;  %v1661_v49 = vadd.f32 %v1660_v36, %v1259_v17 }
 0x6ae   : > { %2908 = vmatpush.bf16.msrb.mxu0 %v4015_v10  ;;  %2922 = vmatpush.bf16.msra.mxu1 %v4023_v11 }
 0x6af   : > { %v1693_v44 = vmax.f32 %v1647_v48, 0.0  ;;  %v1694_v6 = vmax.f32 %v1661_v49, 0.0 }
 0x6b0   : > { %2935 = vmatpush.bf16.msra.mxu2 %v4032_v14  ;;  %2949 = vmatpush.bf16.msrb.mxu3 %v4040_v15 }
 0x6b1   : > { %v1709_v57 = vpack.c.bf16 %v1693_v44, %v1677_v34  ;;  %v1710_v59 = vpack.c.bf16 %v1694_v6, %v1678_v46 }
 0x6b2   : > { %2909 = vmatpush.bf16.msrb.mxu0 %v4014_v16  ;;  %2923 = vmatpush.bf16.msra.mxu1 %v4022_v18 }
 0x6b4   : > { %2936 = vmatpush.bf16.msra.mxu2 %v4031_v22  ;;  %2950 = vmatpush.bf16.msrb.mxu3 %v4039_v23 }
 0x6b6   : > { %2910 = vmatpush.bf16.msrb.mxu0 %v4013_v58  ;;  %2924 = vmatpush.bf16.msra.mxu1 %v4021_v27 }
 0x6b8   : > { %2937 = vmatpush.bf16.msra.mxu2 %v4030_v30  ;;  %2951 = vmatpush.bf16.msrb.mxu3 %v4038_v31 }
 0x6ba   : > { %2911 = vmatpush.bf16.msrb.mxu0 %v4012_v37  ;;  %2925 = vmatpush.bf16.msra.mxu1 %v4020_v39 }
 0x6bc   : > { %2938 = vmatpush.bf16.msra.mxu2 %v4029_v40  ;;  %2952 = vmatpush.bf16.msrb.mxu3 %v4037_v41 }
 0x6bd   : > { %2912 = vmatmul.bf16.vlgmr.msrb.gmra.mxu0 %v1707_v53  ;;  %2926 = vmatmul.bf16.vlgmr.msra.gmra.mxu1 %v1708_v54 }
 0x6c0   : > { %2939 = vmatpush.bf16.msra.mxu2 %v4028_v51  ;;  %2953 = vmatpush.bf16.msrb.mxu3 %v4036_v55 }
 0x6c3   : > { %2940 = vmatmul.bf16.vlgmr.msra.gmra.mxu2 %v1709_v57  ;;  %2954 = vmatmul.bf16.vlgmr.msrb.gmra.mxu3 %v1710_v59 }
 0x6f9   : > { %v2745_v38 = vpop.f32.mrf.mxu0  ;;  %v2759_v61 = vpop.f32.mrf.mxu1 }
 0x6fa   : > { %v2746_v7 = vadd.f32 %v2745_v38, %v1967_v60 }
 0x6fc   : > { %v2760_v10 = vadd.f32 %v2759_v61, %v2746_v7 }
 0x701   : > { %v2747_v62 = vpop.f32.mrf.mxu0  ;;  %v2761_v0 = vpop.f32.mrf.mxu1 }
 0x702   : > { %v2748_v15 = vadd.f32 %v2747_v62, %v1967_v60 }
 0x704   : > { %v2762_v18 = vadd.f32 %v2761_v0, %v2748_v15 }
 0x706   : > { %v2773_v63 = vpop.f32.mrf.mxu2  ;;  %v2787_v25 = vpop.f32.mrf.mxu3 }
 0x707   : > { %v2774_v11 = vadd.f32 %v2773_v63, %v2760_v10 }
 0x709   : > { %v2788_v16 = vadd.f32 %v2787_v25, %v2774_v11 }
 0x70a   : > { %v2801_v1 = vpop.f32.mrf.mxu0  ;;  %v2815_v9 = vpop.f32.mrf.mxu1 }
 0x70b   : > { %v2802_v21 = vadd.f32 %v2801_v1, %v2788_v16 }
 0x70d   : > { %v2816_v42 = vadd.f32 %v2815_v9, %v2802_v21 }
 0x70e   : > { %v2775_v2 = vpop.f32.mrf.mxu2  ;;  %v2789_v4 = vpop.f32.mrf.mxu3 }
 0x70f   : > { %v2776_v22 = vadd.f32 %v2775_v2, %v2762_v18 }
 0x711   : > { %v2790_v58 = vadd.f32 %v2789_v4, %v2776_v22 }
 0x712   : > { %v2803_v12 = vpop.f32.mrf.mxu0  ;;  %v2817_v19 = vpop.f32.mrf.mxu1 }
 0x713   : > { %v2804_v28 = vadd.f32 %v2803_v12, %v2790_v58 }
 0x715   : > { %v2818_v31 = vadd.f32 %v2817_v19, %v2804_v28 }
 0x716   : > { %v2829_v13 = vpop.f32.mrf.mxu2  ;;  %v2843_v14 = vpop.f32.mrf.mxu3 }
 0x717   : > { %v2830_v27 = vadd.f32 %v2829_v13, %v2816_v42 }
 0x719   : > { %v2844_v30 = vadd.f32 %v2843_v14, %v2830_v27 }
 0x71a   : > { %v2857_v23 = vpop.f32.mrf.mxu0  ;;  %v2871_v3 = vpop.f32.mrf.mxu1 }
 0x71b   : > { %v2858_v36 = vadd.f32 %v2857_v23, %v2844_v30 }
 0x71d   : > { %v2872_v39 = vadd.f32 %v2871_v3, %v2858_v36  ;;  %v4164_v3 = vld [vmem:[%s4292_s21] sm:$0xff] }
 0x71e   : > { %v2831_v24 = vpop.f32.mrf.mxu2  ;;  %v2845_v26 = vpop.f32.mrf.mxu3  ;;  %v3006_v30 = vperm.slane %v4164_v3, 7 }
 0x71f   : > { %v2832_v37 = vadd.f32 %v2831_v24, %v2818_v31 }
 0x721   : > { %v2846_v8 = vadd.f32 %v2845_v26, %v2832_v37 }
 0x722   : > { %v2859_v32 = vpop.f32.mrf.mxu0  ;;  %v2873_v17 = vpop.f32.mrf.mxu1 }
 0x723   : > { %v2860_v40 = vadd.f32 %v2859_v32, %v2846_v8 }
 0x725   : > { %v2874_v48 = vadd.f32 %v2873_v17, %v2860_v40 }
 0x726   : > { %v2885_v33 = vpop.f32.mrf.mxu2  ;;  %v2899_v35 = vpop.f32.mrf.mxu3 }
 0x727   : > { %v2886_v29 = vadd.f32 %v2885_v33, %v2872_v39  ;;  %v4120_v33 = vld [vmem:[%s4292_s21 + $0x8] ss:$0 sm:$0xff] }
 0x729   : > { %v2900_v45 = vadd.f32 %v2899_v35, %v2886_v29 }
 0x72e   : > { %v2887_v41 = vpop.f32.mrf.mxu2  ;;  %v2901_v43 = vpop.f32.mrf.mxu3 }
 0x72f   : > { %v2888_v52 = vadd.f32 %v2887_v41, %v2874_v48 }
 0x731   : > { %v2902_v44 = vadd.f32 %v2901_v43, %v2888_v52 }
 0x73a   : > { %v2913_v20 = vpop.f32.mrf.mxu0  ;;  %v2927_v50 = vpop.f32.mrf.mxu1 }
 0x73b   : > { %v2914_v49 = vadd.f32 %v2913_v20, %v2900_v45 }
 0x73d   : > { %v2928_v53 = vadd.f32 %v2927_v50, %v2914_v49 }
 0x742   : > { %v2915_v54 = vpop.f32.mrf.mxu0  ;;  %v2929_v59 = vpop.f32.mrf.mxu1 }
 0x743   : > { %v2916_v34 = vadd.f32 %v2915_v54, %v2902_v44 }
 0x745   : > { %v2930_v38 = vadd.f32 %v2929_v59, %v2916_v34 }
 0x746   : > { %v2941_v51 = vpop.f32.mrf.mxu2  ;;  %v2955_v55 = vpop.f32.mrf.mxu3 }
 0x747   : > { %v2942_v6 = vadd.f32 %v2941_v51, %v2928_v53 }
 0x749   : > { %v2956_v46 = vadd.f32 %v2955_v55, %v2942_v6 }
 0x74b   : > { %v2960_v57 = vadd.f32 %v2956_v46, %v4520_v47 }
 0x74d   : > { %v2962_v61 = vsel %vm393_vm1, %v2960_v57, 0.0 }
 0x74e   : > { %v2943_v62 = vpop.f32.mrf.mxu2  ;;  %2963 = vadd.xlane.f32.xlu2 %v2962_v61  ;;  %v2957_v25 = vpop.f32.mrf.mxu3 }
 0x74f   : > { %v2944_v63 = vadd.f32 %v2943_v62, %v2930_v38 }
 0x751   : > { %v2958_v0 = vadd.f32 %v2957_v25, %v2944_v63 }
 0x753   : > { %v2961_v60 = vadd.f32 %v2958_v0, %v4522_v56 }
 0x755   : > { %v2965_v1 = vsel %vm393_vm1, %v2961_v60, 0.0 }
 0x756   : > { %2966 = vadd.xlane.f32.xlu0 %v2965_v1 }
 0x7c1   : > { %v2964_v2 = vpop.xlane.xlu2 %2963 }
 0x7c2   : > { %v2968_v4 = vmul.f32 %v2964_v2, %v4455_v5 }
 0x7c4   : > { %v2970_v7 = vsub.f32 %v2960_v57, %v2968_v4 }
 0x7c6   : > { %v2972_v9 = vmul.f32 %v2970_v7, %v2970_v7 }
 0x7c8   : > { %v2974_v47 = vsel %vm393_vm1, %v2972_v9, 0.0 }
 0x7c9   : > { %v2967_v10 = vpop.xlane.xlu0 %2966  ;;  %2975 = vadd.xlane.f32.xlu1 %v2974_v47 }
 0x7ca   : > { %v2969_v11 = vmul.f32 %v2967_v10, %v4455_v5 }
 0x7cc   : > { %v2971_v12 = vsub.f32 %v2961_v60, %v2969_v11 }
 0x7ce   : > { %v2973_v13 = vmul.f32 %v2971_v12, %v2971_v12 }
 0x7d0   : > { %v2977_v14 = vsel %vm393_vm1, %v2973_v13, 0.0 }
 0x7d1   : > { %2978 = vadd.xlane.f32.xlu2 %v2977_v14 }
 0x83c   : > { %v2976_v56 = vpop.xlane.xlu1 %2975 }
 0x83d   : > { %v2980_v15 = vmul.f32 %v2976_v56, %v4455_v5 }
 0x83f   : > { %v2982_v16 = vadd.f32 1e-05, %v2980_v15 }
 0x841   : > { %4159 = vrsqrt.f32 %v2982_v16  ;;  %vm2990_vm0 = vweird.f32 %v2982_v16 }
 0x844   : > { %v2979_v18 = vpop.xlane.xlu2 %2978 }
 0x845   : > { %v2981_v19 = vmul.f32 %v2979_v18, %v4455_v5 }
 0x847   : > { %v4160_v21 = vpop.eup %4159  ;;  %v2983_v22 = vadd.f32 1e-05, %v2981_v19 }
 0x848   : > { %v2985_v23 = vmul.f32 %v4160_v21, %v2982_v16  ;;  %vm2991_vm15 = vweird.f32 %v4160_v21 }
 0x849   : > { %4161 = vrsqrt.f32 %v2983_v22  ;;  %vm2992_vm3 = vmor %vm2990_vm0, %vm2991_vm15  ;;  %vm3000_vm5 = vweird.f32 %v2983_v22 }
 0x84a   : > { %v2986_v24 = vmul.f32 %v4160_v21, %v2985_v23 }
 0x84c   : > { %v2987_v26 = vmul.f32 0.5, %v2986_v24 }
 0x84e   : > { %v2988_v42 = vsub.f32 1.5, %v2987_v26 }
 0x84f   : > { %v4162_v58 = vpop.eup %4161 }
 0x850   : > { %v2989_v27 = vmul.f32 %v4160_v21, %v2988_v42  ;;  %v2995_v28 = vmul.f32 %v4162_v58, %v2983_v22  ;;  %vm3001_vm4 = vweird.f32 %v4162_v58 }
 0x851   : > { %vm3002_vm6 = vmor %vm3000_vm5, %vm3001_vm4 }
 0x852   : > { %v2993_v31 = vsel %vm2992_vm3, %v4160_v21, %v2989_v27  ;;  %v2996_v32 = vmul.f32 %v4162_v58, %v2995_v28 }
 0x853   : > { %v3004_v5 = vmul.f32 %v2993_v31, %v2970_v7 }
 0x854   : > { %v2997_v35 = vmul.f32 0.5, %v2996_v32 }
 0x855   : > { %v3007_v36 = vmul.f32 %v3006_v30, %v3004_v5 }
 0x856   : > { %v2998_v37 = vsub.f32 1.5, %v2997_v35 }
 0x857   : > { %v3010_v39 = vadd.f32 %v4120_v33, %v3007_v36 }
 0x858   : > { %v2999_v8 = vmul.f32 %v4162_v58, %v2998_v37 }
 0x859   : > { %3012 = vst.msk [vmem:[#allocation2] sm:$0xff] %vm393_vm1, %v3010_v39 }
 0x85a   : > { %v3003_v17 = vsel %vm3002_vm6, %v4162_v58, %v2999_v8 }
 0x85b   : > { %v3005_v29 = vmul.f32 %v3003_v17, %v2971_v12 }
 0x85d   : > { %v3008_v20 = vmul.f32 %v3006_v30, %v3005_v29  ;;  %3017 = sbr.rel (%p3870_p5) target bundleno = 2167 (0x877), region = 56 }
 0x85f   : > { %v3011_v40 = vadd.f32 %v4120_v33, %v3008_v20 }
 0x861   : > { %3013 = vst.msk [vmem:[#allocation2 + $0x8] sm:$0xff] %vm393_vm1, %v3011_v40 }
 0x862   : > { %v3018_v41 = vsel %vm393_vm1, %v3010_v39, 0.0  ;;  %v3025_v43 = vsel %vm393_vm1, %v3011_v40, 0.0  ;;  %v4217_v49 = vmov 8.0   ;;  %vm3043_vm1 = vcmask 1041409  }
 0x863   : > { %v3019_v45 = vrot.slane %v3018_v41, 4  ;;  %v3026_v48 = vrot.slane %v3025_v43, 4  ;;  %4165 = vrcp.f32 %v4217_v49  ;;  %vm3046_vm8 = vcmask 254976  }
 0x865   : > { %v3020_v50 = vadd.f32 %v3019_v45, %v3018_v41  ;;  %v3027_v52 = vadd.f32 %v3026_v48, %v3025_v43 }
 0x867   : > { %v3021_v53 = vrot.slane %v3020_v50, 2  ;;  %v3028_v54 = vrot.slane %v3027_v52, 2 }
 0x869   : > { %v4166_v51 = vpop.eup %4165  ;;  %v3022_v55 = vadd.f32 %v3021_v53, %v3020_v50  ;;  %v3029_v44 = vadd.f32 %v3028_v54, %v3027_v52 }
 0x86a   : > { %v3033_v6 = vmul.f32 8.0, %v4166_v51  ;;  %vm3037_vm7 = vweird.f32 %v4166_v51 }
 0x86b   : > { %v3023_v34 = vrot.slane %v3022_v55, 1  ;;  %v3030_v46 = vrot.slane %v3029_v44, 1 }
 0x86c   : > { %v3034_v57 = vsub.f32 1.0, %v3033_v6 }
 0x86d   : > { %v3024_v38 = vadd.f32 %v3023_v34, %v3022_v55  ;;  %v3031_v61 = vadd.f32 %v3030_v46, %v3029_v44 }
 0x86e   : > { %v3035_v59 = vmul.f32 %v4166_v51, %v3034_v57 }
 0x870   : > { %v3036_v62 = vadd.f32 %v4166_v51, %v3035_v59 }
 0x872   : > { %v3038_v63 = vsel %vm3037_vm7, %v4166_v51, %v3036_v62 }
 0x873   : > { %v3039_v25 = vmul.f32 %v3038_v63, %v3024_v38  ;;  %v3040_v0 = vmul.f32 %v3038_v63, %v3031_v61 }
 0x875   : > { %v3044_v60 = vsel %vm3043_vm1, %v3040_v0, %v3039_v25 }
 0x876   : > { %3047 = vst.msk [vmem:[#allocation3] sm:$0x3] %vm3046_vm8, %v3044_v60 }
 0x877 PF: > { %p4048_p6 = scmp.eq.s32.totalorder %s4265_s25, 1  ;;  %s4218_s11 = smov [#allocation3]  }
 0x878   : > { %s3054_s14 = sshll.u32 %s4218_s11, 4  ;;  %s3056_s21 = sshll.u32 %s4769_s7, 4  ;;  %s3055_s14 = int_to_ptr.vmem [resolvable:$true] %s3054_s14  ;;  %s3057_s21 = int_to_ptr.hbm [resolvable:$true] %s3056_s21 }
 0x879   : > { %4045 = dma.vmem_to_hbm [thread:$0]  (%p4048_p6), %s3055_s14, 32, %s3057_s21, [#allocation4]  }
 0x87a   : > { %4200 = dma.done.wait (%p4048_p6), [#allocation4], 32  }
 0x87b   : > { %4202 = vsyncadd (%p4048_p6), [#allocation4], 4294967264 }
 0x87c PF: > { %s18_s24 = sadd.s32 1, %s4205_s24  }
 0x87d   : > { %p15_p7 = scmp.ge.s32.totalorder %s18_s24, 4  }
 0x87f   :  { %17 = sbr.rel (!%p15_p7) target bundleno = 1 (0x1), region = 98 }
 0x884   :  { %3070 = vsyncpa [#allocation4], 1 }
 0x885   :  { %3072 = vsyncpa [#allocation4 + $0x1], 1 }

</bundles_post_ra>
